<compile_context>
chip_gen: v6e
topology: v6e:2x2x1
jax: 0.10.0
libtpu: 0.0.40
codegen_flags: <defaults>
</compile_context>

<pallas_src>
import functools

import jax
import jax.numpy as jnp
from jax.experimental import pallas as pl
from jax.experimental.pallas import tpu as pltpu


def _make_fused_kernel(num_layers, T, B, H, F):
    """Builds the fused LSTM-stack + linear-head kernel for static sizes."""

    def kernel(*refs):
        # refs = [x, (w_ih, w_hh, b) * L, h0, c0, w_out, b_out, out, seq_scr]
        x_ref = refs[0]                                   # (T, B, F) time-major
        layer_refs = refs[1:1 + 3 * num_layers]
        (h0_ref, c0_ref, wout_ref, bout_ref,
         out_ref, seq_scr) = refs[1 + 3 * num_layers:]

        # Current layer input, flattened time-major: row index = t*B + b.
        cur_in = x_ref[...].reshape(T * B, F)             # (T*B, D_in)

        h_last = None
        for l in range(num_layers):
            w_ih = layer_refs[3 * l][...]                 # (D_in, 4H)
            w_hh = layer_refs[3 * l + 1][...]             # (H,    4H)
            b = layer_refs[3 * l + 2][...]                # (1,    4H)

            # Hoisted input projection + bias for ALL timesteps at once
            # (single well-shaped MXU op; bias broadcast happens once).
            x_proj = jnp.dot(cur_in, w_ih,
                             preferred_element_type=jnp.float32) + b  # (T*B, 4H)

            # h/c stay in vregs across the unrolled recurrence.
            h = h0_ref[l]                                 # (B, H)
            c = c0_ref[l]                                 # (B, H)
            last_layer = (l == num_layers - 1)

            for t in range(T):                            # fully unrolled, T static
                gates = x_proj[t * B:(t + 1) * B, :] + jnp.dot(
                    h, w_hh, preferred_element_type=jnp.float32)       # (B, 4H)
                sg = jax.nn.sigmoid(gates)                # one EUP pass over vreg
                i = sg[:, 0:H]
                f = sg[:, H:2 * H]
                o = sg[:, 3 * H:4 * H]
                g = jnp.tanh(gates[:, 2 * H:3 * H])
                c = f * c + i * g
                h = o * jnp.tanh(c)
                if not last_layer:
                    # VMEM-resident inter-layer sequence (no HBM round trip).
                    seq_scr[t * B:(t + 1) * B, :] = h
            if not last_layer:
                cur_in = seq_scr[...]                     # (T*B, H)
            h_last = h

        # Fused linear head on the last timestep's hidden state.
        out_ref[...] = (jnp.dot(h_last, wout_ref[...],
                                preferred_element_type=jnp.float32)
                        + bout_ref[...])

    return kernel


@functools.partial(jax.jit, static_argnames=("num_layers",))
def mymodel_forward(x_btf, params, h0, c0, *, num_layers):
    """x_btf: (B, T, input_size), batch_first like the PyTorch module."""
    B, T, F = x_btf.shape
    H = h0.shape[-1]

    # Single tiny boundary transpose to time-major; everything else is fused
    # in one pallas_call with VMEM-resident intermediates.
    x_tbf = jnp.transpose(x_btf, (1, 0, 2))               # (T, B, F)

    flat_weights = []
    for (w_ih, w_hh, b) in params["layers"]:
        flat_weights += [w_ih, w_hh, b]

    kernel = _make_fused_kernel(num_layers, T, B, H, F)
    vmem = pl.BlockSpec(memory_space=pltpu.MemorySpace.VMEM)
    n_in = 1 + 3 * num_layers + 4

    return pl.pallas_call(
        kernel,
        out_shape=jax.ShapeDtypeStruct((B, 2), jnp.float32),
        in_specs=[vmem] * n_in,
        out_specs=vmem,
        scratch_shapes=[pltpu.VMEM((T * B, H), jnp.float32)],
    )(x_tbf, *flat_weights, h0, c0, params["w_out"], params["b_out"])


def init_params(key, input_size, hidden_size, num_layers):
    """Deterministic PyTorch-style uniform(-1/sqrt(H), 1/sqrt(H)) init."""
    bound = 1.0 / jnp.sqrt(jnp.float32(hidden_size))
    layers = []
    for l in range(num_layers):
        d_in = input_size if l == 0 else hidden_size
        key, k1, k2, k3, k4 = jax.random.split(key, 5)
        w_ih = jax.random.uniform(k1, (d_in, 4 * hidden_size), jnp.float32,
                                  -bound, bound)            # stored transposed
        w_hh = jax.random.uniform(k2, (hidden_size, 4 * hidden_size),
                                  jnp.float32, -bound, bound)
        b_ih = jax.random.uniform(k3, (4 * hidden_size,), jnp.float32,
                                  -bound, bound)
        b_hh = jax.random.uniform(k4, (4 * hidden_size,), jnp.float32,
                                  -bound, bound)
        layers.append((w_ih, w_hh, (b_ih + b_hh)[None, :]))
    key, k5, k6 = jax.random.split(key, 3)
    w_out = jax.random.uniform(k5, (hidden_size, 2), jnp.float32,
                               -bound, bound)               # stored transposed
    b_out = jax.random.uniform(k6, (1, 2), jnp.float32, -bound, bound)
    return {"layers": layers, "w_out": w_out, "b_out": b_out}


if __name__ == "__main__":
    input_size, hidden_size, num_layers = 16, 32, 2
    batch, seq = 8, 8

    key = jax.random.PRNGKey(0)
    key, kx, kh, kc, kp = jax.random.split(key, 5)

    x = jax.random.normal(kx, (batch, seq, input_size), jnp.float32)
    # initHidden: torch.rand -> Uniform[0, 1)
    h0 = jax.random.uniform(kh, (num_layers, batch, hidden_size), jnp.float32)
    c0 = jax.random.uniform(kc, (num_layers, batch, hidden_size), jnp.float32)
    params = init_params(kp, input_size, hidden_size, num_layers)

    out = mymodel_forward(x, params, h0, c0, num_layers=num_layers)
    out = jax.block_until_ready(out)
    assert out.shape == (batch, 2), out.shape
    print("KERNEL_OK")
</pallas_src>

<mosaic_0001>
module attributes {stable_mosaic.version = 11 : i64} {
  func.func @kernel(%arg0: memref<8x8x16xf32, #tpu.memory_space<vmem>>, %arg1: memref<16x128xf32, #tpu.memory_space<vmem>>, %arg2: memref<32x128xf32, #tpu.memory_space<vmem>>, %arg3: memref<1x128xf32, #tpu.memory_space<vmem>>, %arg4: memref<32x128xf32, #tpu.memory_space<vmem>>, %arg5: memref<32x128xf32, #tpu.memory_space<vmem>>, %arg6: memref<1x128xf32, #tpu.memory_space<vmem>>, %arg7: memref<2x8x32xf32, #tpu.memory_space<vmem>>, %arg8: memref<2x8x32xf32, #tpu.memory_space<vmem>>, %arg9: memref<32x2xf32, #tpu.memory_space<vmem>>, %arg10: memref<1x2xf32, #tpu.memory_space<vmem>>, %arg11: memref<8x2xf32, #tpu.memory_space<vmem>>, %arg12: memref<64x32xf32, #tpu.memory_space<vmem>>) attributes {dimension_semantics = [], scalar_prefetch = 0 : i64, scratch_operands = 1 : i64, tpu.core_type = #tpu.core_type<tc>} {
    %c0 = arith.constant 0 : index
    %c0_0 = arith.constant 0 : index
    %c0_1 = arith.constant 0 : index
    %0 = vector.load %arg0[%c0, %c0_0, %c0_1] : memref<8x8x16xf32, #tpu.memory_space<vmem>>, vector<8x8x16xf32>
    %1 = vector.shape_cast %0 : vector<8x8x16xf32> to vector<64x16xf32>
    %c0_2 = arith.constant 0 : index
    %c0_3 = arith.constant 0 : index
    %2 = vector.load %arg1[%c0_2, %c0_3] : memref<16x128xf32, #tpu.memory_space<vmem>>, vector<16x128xf32>
    %c0_4 = arith.constant 0 : index
    %c0_5 = arith.constant 0 : index
    %3 = vector.load %arg2[%c0_4, %c0_5] : memref<32x128xf32, #tpu.memory_space<vmem>>, vector<32x128xf32>
    %c0_6 = arith.constant 0 : index
    %c0_7 = arith.constant 0 : index
    %4 = vector.load %arg3[%c0_6, %c0_7] : memref<1x128xf32, #tpu.memory_space<vmem>>, vector<1x128xf32>
    %cst = arith.constant dense<0.000000e+00> : vector<64x128xf32>
    %5 = tpu.matmul %1, %2, %cst {dimension_numbers = #tpu.dot_dimension_numbers<[1], [0], [0], [1], [0, 0, 1, 1], [], []>} : vector<64x16xf32>, vector<16x128xf32>, vector<64x128xf32> -> vector<64x128xf32>
    %6 = vector.broadcast %4 : vector<1x128xf32> to vector<64x128xf32>
    %7 = arith.addf %5, %6 : vector<64x128xf32>
    %c0_8 = arith.constant 0 : index
    %c0_9 = arith.constant 0 : index
    %c0_10 = arith.constant 0 : index
    %8 = vector.load %arg7[%c0_8, %c0_9, %c0_10] : memref<2x8x32xf32, #tpu.memory_space<vmem>>, vector<1x8x32xf32>
    %9 = vector.shape_cast %8 : vector<1x8x32xf32> to vector<8x32xf32>
    %c0_11 = arith.constant 0 : index
    %c0_12 = arith.constant 0 : index
    %c0_13 = arith.constant 0 : index
    %10 = vector.load %arg8[%c0_11, %c0_12, %c0_13] : memref<2x8x32xf32, #tpu.memory_space<vmem>>, vector<1x8x32xf32>
    %11 = vector.shape_cast %10 : vector<1x8x32xf32> to vector<8x32xf32>
    %12 = vector.extract_strided_slice %7 {offsets = [0, 0], sizes = [8, 128], strides = [1, 1]} : vector<64x128xf32> to vector<8x128xf32>
    %cst_14 = arith.constant dense<0.000000e+00> : vector<8x128xf32>
    %13 = tpu.matmul %9, %3, %cst_14 {dimension_numbers = #tpu.dot_dimension_numbers<[1], [0], [0], [1], [0, 0, 1, 1], [], []>} : vector<8x32xf32>, vector<32x128xf32>, vector<8x128xf32> -> vector<8x128xf32>
    %14 = arith.addf %12, %13 : vector<8x128xf32>
    %15 = arith.negf %14 : vector<8x128xf32>
    %16 = math.exp %15 : vector<8x128xf32>
    %cst_15 = arith.constant 1.000000e+00 : f32
    %17 = vector.broadcast %cst_15 : f32 to vector<8x128xf32>
    %18 = arith.addf %17, %16 : vector<8x128xf32>
    %19 = arith.divf %17, %18 : vector<8x128xf32>
    %20 = vector.extract_strided_slice %19 {offsets = [0, 0], sizes = [8, 32], strides = [1, 1]} : vector<8x128xf32> to vector<8x32xf32>
    %21 = vector.extract_strided_slice %19 {offsets = [0, 32], sizes = [8, 32], strides = [1, 1]} : vector<8x128xf32> to vector<8x32xf32>
    %22 = vector.extract_strided_slice %19 {offsets = [0, 96], sizes = [8, 32], strides = [1, 1]} : vector<8x128xf32> to vector<8x32xf32>
    %23 = vector.extract_strided_slice %14 {offsets = [0, 64], sizes = [8, 32], strides = [1, 1]} : vector<8x128xf32> to vector<8x32xf32>
    %24 = math.tanh %23 : vector<8x32xf32>
    %25 = arith.mulf %21, %11 : vector<8x32xf32>
    %26 = arith.mulf %20, %24 : vector<8x32xf32>
    %27 = arith.addf %25, %26 : vector<8x32xf32>
    %28 = math.tanh %27 : vector<8x32xf32>
    %29 = arith.mulf %22, %28 : vector<8x32xf32>
    %c0_16 = arith.constant 0 : index
    %c0_17 = arith.constant 0 : index
    %30 = vector.load %arg12[%c0_16, %c0_17] : memref<64x32xf32, #tpu.memory_space<vmem>>, vector<8x32xf32>
    tpu.vector_store %arg12[%c0_16, %c0_17], %29 {strides = array<i32>} : memref<64x32xf32, #tpu.memory_space<vmem>>, vector<8x32xf32>,
    %31 = vector.extract_strided_slice %7 {offsets = [8, 0], sizes = [8, 128], strides = [1, 1]} : vector<64x128xf32> to vector<8x128xf32>
    %cst_18 = arith.constant dense<0.000000e+00> : vector<8x128xf32>
    %32 = tpu.matmul %29, %3, %cst_18 {dimension_numbers = #tpu.dot_dimension_numbers<[1], [0], [0], [1], [0, 0, 1, 1], [], []>} : vector<8x32xf32>, vector<32x128xf32>, vector<8x128xf32> -> vector<8x128xf32>
    %33 = arith.addf %31, %32 : vector<8x128xf32>
    %34 = arith.negf %33 : vector<8x128xf32>
    %35 = math.exp %34 : vector<8x128xf32>
    %cst_19 = arith.constant 1.000000e+00 : f32
    %36 = vector.broadcast %cst_19 : f32 to vector<8x128xf32>
    %37 = arith.addf %36, %35 : vector<8x128xf32>
    %38 = arith.divf %36, %37 : vector<8x128xf32>
    %39 = vector.extract_strided_slice %38 {offsets = [0, 0], sizes = [8, 32], strides = [1, 1]} : vector<8x128xf32> to vector<8x32xf32>
    %40 = vector.extract_strided_slice %38 {offsets = [0, 32], sizes = [8, 32], strides = [1, 1]} : vector<8x128xf32> to vector<8x32xf32>
    %41 = vector.extract_strided_slice %38 {offsets = [0, 96], sizes = [8, 32], strides = [1, 1]} : vector<8x128xf32> to vector<8x32xf32>
    %42 = vector.extract_strided_slice %33 {offsets = [0, 64], sizes = [8, 32], strides = [1, 1]} : vector<8x128xf32> to vector<8x32xf32>
    %43 = math.tanh %42 : vector<8x32xf32>
    %44 = arith.mulf %40, %27 : vector<8x32xf32>
    %45 = arith.mulf %39, %43 : vector<8x32xf32>
    %46 = arith.addf %44, %45 : vector<8x32xf32>
    %47 = math.tanh %46 : vector<8x32xf32>
    %48 = arith.mulf %41, %47 : vector<8x32xf32>
    %c8 = arith.constant 8 : index
    %c0_20 = arith.constant 0 : index
    %49 = vector.load %arg12[%c8, %c0_20] : memref<64x32xf32, #tpu.memory_space<vmem>>, vector<8x32xf32>
    tpu.vector_store %arg12[%c8, %c0_20], %48 {strides = array<i32>} : memref<64x32xf32, #tpu.memory_space<vmem>>, vector<8x32xf32>,
    %50 = vector.extract_strided_slice %7 {offsets = [16, 0], sizes = [8, 128], strides = [1, 1]} : vector<64x128xf32> to vector<8x128xf32>
    %cst_21 = arith.constant dense<0.000000e+00> : vector<8x128xf32>
    %51 = tpu.matmul %48, %3, %cst_21 {dimension_numbers = #tpu.dot_dimension_numbers<[1], [0], [0], [1], [0, 0, 1, 1], [], []>} : vector<8x32xf32>, vector<32x128xf32>, vector<8x128xf32> -> vector<8x128xf32>
    %52 = arith.addf %50, %51 : vector<8x128xf32>
    %53 = arith.negf %52 : vector<8x128xf32>
    %54 = math.exp %53 : vector<8x128xf32>
    %cst_22 = arith.constant 1.000000e+00 : f32
    %55 = vector.broadcast %cst_22 : f32 to vector<8x128xf32>
    %56 = arith.addf %55, %54 : vector<8x128xf32>
    %57 = arith.divf %55, %56 : vector<8x128xf32>
    %58 = vector.extract_strided_slice %57 {offsets = [0, 0], sizes = [8, 32], strides = [1, 1]} : vector<8x128xf32> to vector<8x32xf32>
    %59 = vector.extract_strided_slice %57 {offsets = [0, 32], sizes = [8, 32], strides = [1, 1]} : vector<8x128xf32> to vector<8x32xf32>
    %60 = vector.extract_strided_slice %57 {offsets = [0, 96], sizes = [8, 32], strides = [1, 1]} : vector<8x128xf32> to vector<8x32xf32>
    %61 = vector.extract_strided_slice %52 {offsets = [0, 64], sizes = [8, 32], strides = [1, 1]} : vector<8x128xf32> to vector<8x32xf32>
    %62 = math.tanh %61 : vector<8x32xf32>
    %63 = arith.mulf %59, %46 : vector<8x32xf32>
    %64 = arith.mulf %58, %62 : vector<8x32xf32>
    %65 = arith.addf %63, %64 : vector<8x32xf32>
    %66 = math.tanh %65 : vector<8x32xf32>
    %67 = arith.mulf %60, %66 : vector<8x32xf32>
    %c16 = arith.constant 16 : index
    %c0_23 = arith.constant 0 : index
    %68 = vector.load %arg12[%c16, %c0_23] : memref<64x32xf32, #tpu.memory_space<vmem>>, vector<8x32xf32>
    tpu.vector_store %arg12[%c16, %c0_23], %67 {strides = array<i32>} : memref<64x32xf32, #tpu.memory_space<vmem>>, vector<8x32xf32>,
    %69 = vector.extract_strided_slice %7 {offsets = [24, 0], sizes = [8, 128], strides = [1, 1]} : vector<64x128xf32> to vector<8x128xf32>
    %cst_24 = arith.constant dense<0.000000e+00> : vector<8x128xf32>
    %70 = tpu.matmul %67, %3, %cst_24 {dimension_numbers = #tpu.dot_dimension_numbers<[1], [0], [0], [1], [0, 0, 1, 1], [], []>} : vector<8x32xf32>, vector<32x128xf32>, vector<8x128xf32> -> vector<8x128xf32>
    %71 = arith.addf %69, %70 : vector<8x128xf32>
    %72 = arith.negf %71 : vector<8x128xf32>
    %73 = math.exp %72 : vector<8x128xf32>
    %cst_25 = arith.constant 1.000000e+00 : f32
    %74 = vector.broadcast %cst_25 : f32 to vector<8x128xf32>
    %75 = arith.addf %74, %73 : vector<8x128xf32>
    %76 = arith.divf %74, %75 : vector<8x128xf32>
    %77 = vector.extract_strided_slice %76 {offsets = [0, 0], sizes = [8, 32], strides = [1, 1]} : vector<8x128xf32> to vector<8x32xf32>
    %78 = vector.extract_strided_slice %76 {offsets = [0, 32], sizes = [8, 32], strides = [1, 1]} : vector<8x128xf32> to vector<8x32xf32>
    %79 = vector.extract_strided_slice %76 {offsets = [0, 96], sizes = [8, 32], strides = [1, 1]} : vector<8x128xf32> to vector<8x32xf32>
    %80 = vector.extract_strided_slice %71 {offsets = [0, 64], sizes = [8, 32], strides = [1, 1]} : vector<8x128xf32> to vector<8x32xf32>
    %81 = math.tanh %80 : vector<8x32xf32>
    %82 = arith.mulf %78, %65 : vector<8x32xf32>
    %83 = arith.mulf %77, %81 : vector<8x32xf32>
    %84 = arith.addf %82, %83 : vector<8x32xf32>
    %85 = math.tanh %84 : vector<8x32xf32>
    %86 = arith.mulf %79, %85 : vector<8x32xf32>
    %c24 = arith.constant 24 : index
    %c0_26 = arith.constant 0 : index
    %87 = vector.load %arg12[%c24, %c0_26] : memref<64x32xf32, #tpu.memory_space<vmem>>, vector<8x32xf32>
    tpu.vector_store %arg12[%c24, %c0_26], %86 {strides = array<i32>} : memref<64x32xf32, #tpu.memory_space<vmem>>, vector<8x32xf32>,
    %88 = vector.extract_strided_slice %7 {offsets = [32, 0], sizes = [8, 128], strides = [1, 1]} : vector<64x128xf32> to vector<8x128xf32>
    %cst_27 = arith.constant dense<0.000000e+00> : vector<8x128xf32>
    %89 = tpu.matmul %86, %3, %cst_27 {dimension_numbers = #tpu.dot_dimension_numbers<[1], [0], [0], [1], [0, 0, 1, 1], [], []>} : vector<8x32xf32>, vector<32x128xf32>, vector<8x128xf32> -> vector<8x128xf32>
    %90 = arith.addf %88, %89 : vector<8x128xf32>
    %91 = arith.negf %90 : vector<8x128xf32>
    %92 = math.exp %91 : vector<8x128xf32>
    %cst_28 = arith.constant 1.000000e+00 : f32
    %93 = vector.broadcast %cst_28 : f32 to vector<8x128xf32>
    %94 = arith.addf %93, %92 : vector<8x128xf32>
    %95 = arith.divf %93, %94 : vector<8x128xf32>
    %96 = vector.extract_strided_slice %95 {offsets = [0, 0], sizes = [8, 32], strides = [1, 1]} : vector<8x128xf32> to vector<8x32xf32>
    %97 = vector.extract_strided_slice %95 {offsets = [0, 32], sizes = [8, 32], strides = [1, 1]} : vector<8x128xf32> to vector<8x32xf32>
    %98 = vector.extract_strided_slice %95 {offsets = [0, 96], sizes = [8, 32], strides = [1, 1]} : vector<8x128xf32> to vector<8x32xf32>
    %99 = vector.extract_strided_slice %90 {offsets = [0, 64], sizes = [8, 32], strides = [1, 1]} : vector<8x128xf32> to vector<8x32xf32>
    %100 = math.tanh %99 : vector<8x32xf32>
    %101 = arith.mulf %97, %84 : vector<8x32xf32>
    %102 = arith.mulf %96, %100 : vector<8x32xf32>
    %103 = arith.addf %101, %102 : vector<8x32xf32>
    %104 = math.tanh %103 : vector<8x32xf32>
    %105 = arith.mulf %98, %104 : vector<8x32xf32>
    %c32 = arith.constant 32 : index
    %c0_29 = arith.constant 0 : index
    %106 = vector.load %arg12[%c32, %c0_29] : memref<64x32xf32, #tpu.memory_space<vmem>>, vector<8x32xf32>
    tpu.vector_store %arg12[%c32, %c0_29], %105 {strides = array<i32>} : memref<64x32xf32, #tpu.memory_space<vmem>>, vector<8x32xf32>,
    %107 = vector.extract_strided_slice %7 {offsets = [40, 0], sizes = [8, 128], strides = [1, 1]} : vector<64x128xf32> to vector<8x128xf32>
    %cst_30 = arith.constant dense<0.000000e+00> : vector<8x128xf32>
    %108 = tpu.matmul %105, %3, %cst_30 {dimension_numbers = #tpu.dot_dimension_numbers<[1], [0], [0], [1], [0, 0, 1, 1], [], []>} : vector<8x32xf32>, vector<32x128xf32>, vector<8x128xf32> -> vector<8x128xf32>
    %109 = arith.addf %107, %108 : vector<8x128xf32>
    %110 = arith.negf %109 : vector<8x128xf32>
    %111 = math.exp %110 : vector<8x128xf32>
    %cst_31 = arith.constant 1.000000e+00 : f32
    %112 = vector.broadcast %cst_31 : f32 to vector<8x128xf32>
    %113 = arith.addf %112, %111 : vector<8x128xf32>
    %114 = arith.divf %112, %113 : vector<8x128xf32>
    %115 = vector.extract_strided_slice %114 {offsets = [0, 0], sizes = [8, 32], strides = [1, 1]} : vector<8x128xf32> to vector<8x32xf32>
    %116 = vector.extract_strided_slice %114 {offsets = [0, 32], sizes = [8, 32], strides = [1, 1]} : vector<8x128xf32> to vector<8x32xf32>
    %117 = vector.extract_strided_slice %114 {offsets = [0, 96], sizes = [8, 32], strides = [1, 1]} : vector<8x128xf32> to vector<8x32xf32>
    %118 = vector.extract_strided_slice %109 {offsets = [0, 64], sizes = [8, 32], strides = [1, 1]} : vector<8x128xf32> to vector<8x32xf32>
    %119 = math.tanh %118 : vector<8x32xf32>
    %120 = arith.mulf %116, %103 : vector<8x32xf32>
    %121 = arith.mulf %115, %119 : vector<8x32xf32>
    %122 = arith.addf %120, %121 : vector<8x32xf32>
    %123 = math.tanh %122 : vector<8x32xf32>
    %124 = arith.mulf %117, %123 : vector<8x32xf32>
    %c40 = arith.constant 40 : index
    %c0_32 = arith.constant 0 : index
    %125 = vector.load %arg12[%c40, %c0_32] : memref<64x32xf32, #tpu.memory_space<vmem>>, vector<8x32xf32>
    tpu.vector_store %arg12[%c40, %c0_32], %124 {strides = array<i32>} : memref<64x32xf32, #tpu.memory_space<vmem>>, vector<8x32xf32>,
    %126 = vector.extract_strided_slice %7 {offsets = [48, 0], sizes = [8, 128], strides = [1, 1]} : vector<64x128xf32> to vector<8x128xf32>
    %cst_33 = arith.constant dense<0.000000e+00> : vector<8x128xf32>
    %127 = tpu.matmul %124, %3, %cst_33 {dimension_numbers = #tpu.dot_dimension_numbers<[1], [0], [0], [1], [0, 0, 1, 1], [], []>} : vector<8x32xf32>, vector<32x128xf32>, vector<8x128xf32> -> vector<8x128xf32>
    %128 = arith.addf %126, %127 : vector<8x128xf32>
    %129 = arith.negf %128 : vector<8x128xf32>
    %130 = math.exp %129 : vector<8x128xf32>
    %cst_34 = arith.constant 1.000000e+00 : f32
    %131 = vector.broadcast %cst_34 : f32 to vector<8x128xf32>
    %132 = arith.addf %131, %130 : vector<8x128xf32>
    %133 = arith.divf %131, %132 : vector<8x128xf32>
    %134 = vector.extract_strided_slice %133 {offsets = [0, 0], sizes = [8, 32], strides = [1, 1]} : vector<8x128xf32> to vector<8x32xf32>
    %135 = vector.extract_strided_slice %133 {offsets = [0, 32], sizes = [8, 32], strides = [1, 1]} : vector<8x128xf32> to vector<8x32xf32>
    %136 = vector.extract_strided_slice %133 {offsets = [0, 96], sizes = [8, 32], strides = [1, 1]} : vector<8x128xf32> to vector<8x32xf32>
    %137 = vector.extract_strided_slice %128 {offsets = [0, 64], sizes = [8, 32], strides = [1, 1]} : vector<8x128xf32> to vector<8x32xf32>
    %138 = math.tanh %137 : vector<8x32xf32>
    %139 = arith.mulf %135, %122 : vector<8x32xf32>
    %140 = arith.mulf %134, %138 : vector<8x32xf32>
    %141 = arith.addf %139, %140 : vector<8x32xf32>
    %142 = math.tanh %141 : vector<8x32xf32>
    %143 = arith.mulf %136, %142 : vector<8x32xf32>
    %c48 = arith.constant 48 : index
    %c0_35 = arith.constant 0 : index
    %144 = vector.load %arg12[%c48, %c0_35] : memref<64x32xf32, #tpu.memory_space<vmem>>, vector<8x32xf32>
    tpu.vector_store %arg12[%c48, %c0_35], %143 {strides = array<i32>} : memref<64x32xf32, #tpu.memory_space<vmem>>, vector<8x32xf32>,
    %145 = vector.extract_strided_slice %7 {offsets = [56, 0], sizes = [8, 128], strides = [1, 1]} : vector<64x128xf32> to vector<8x128xf32>
    %cst_36 = arith.constant dense<0.000000e+00> : vector<8x128xf32>
    %146 = tpu.matmul %143, %3, %cst_36 {dimension_numbers = #tpu.dot_dimension_numbers<[1], [0], [0], [1], [0, 0, 1, 1], [], []>} : vector<8x32xf32>, vector<32x128xf32>, vector<8x128xf32> -> vector<8x128xf32>
    %147 = arith.addf %145, %146 : vector<8x128xf32>
    %148 = arith.negf %147 : vector<8x128xf32>
    %149 = math.exp %148 : vector<8x128xf32>
    %cst_37 = arith.constant 1.000000e+00 : f32
    %150 = vector.broadcast %cst_37 : f32 to vector<8x128xf32>
    %151 = arith.addf %150, %149 : vector<8x128xf32>
    %152 = arith.divf %150, %151 : vector<8x128xf32>
    %153 = vector.extract_strided_slice %152 {offsets = [0, 0], sizes = [8, 32], strides = [1, 1]} : vector<8x128xf32> to vector<8x32xf32>
    %154 = vector.extract_strided_slice %152 {offsets = [0, 32], sizes = [8, 32], strides = [1, 1]} : vector<8x128xf32> to vector<8x32xf32>
    %155 = vector.extract_strided_slice %152 {offsets = [0, 96], sizes = [8, 32], strides = [1, 1]} : vector<8x128xf32> to vector<8x32xf32>
    %156 = vector.extract_strided_slice %147 {offsets = [0, 64], sizes = [8, 32], strides = [1, 1]} : vector<8x128xf32> to vector<8x32xf32>
    %157 = math.tanh %156 : vector<8x32xf32>
    %158 = arith.mulf %154, %141 : vector<8x32xf32>
    %159 = arith.mulf %153, %157 : vector<8x32xf32>
    %160 = arith.addf %158, %159 : vector<8x32xf32>
    %161 = math.tanh %160 : vector<8x32xf32>
    %162 = arith.mulf %155, %161 : vector<8x32xf32>
    %c56 = arith.constant 56 : index
    %c0_38 = arith.constant 0 : index
    %163 = vector.load %arg12[%c56, %c0_38] : memref<64x32xf32, #tpu.memory_space<vmem>>, vector<8x32xf32>
    tpu.vector_store %arg12[%c56, %c0_38], %162 {strides = array<i32>} : memref<64x32xf32, #tpu.memory_space<vmem>>, vector<8x32xf32>,
    %c0_39 = arith.constant 0 : index
    %c0_40 = arith.constant 0 : index
    %164 = vector.load %arg12[%c0_39, %c0_40] : memref<64x32xf32, #tpu.memory_space<vmem>>, vector<64x32xf32>
    %c0_41 = arith.constant 0 : index
    %c0_42 = arith.constant 0 : index
    %165 = vector.load %arg4[%c0_41, %c0_42] : memref<32x128xf32, #tpu.memory_space<vmem>>, vector<32x128xf32>
    %c0_43 = arith.constant 0 : index
    %c0_44 = arith.constant 0 : index
    %166 = vector.load %arg5[%c0_43, %c0_44] : memref<32x128xf32, #tpu.memory_space<vmem>>, vector<32x128xf32>
    %c0_45 = arith.constant 0 : index
    %c0_46 = arith.constant 0 : index
    %167 = vector.load %arg6[%c0_45, %c0_46] : memref<1x128xf32, #tpu.memory_space<vmem>>, vector<1x128xf32>
    %cst_47 = arith.constant dense<0.000000e+00> : vector<64x128xf32>
    %168 = tpu.matmul %164, %165, %cst_47 {dimension_numbers = #tpu.dot_dimension_numbers<[1], [0], [0], [1], [0, 0, 1, 1], [], []>} : vector<64x32xf32>, vector<32x128xf32>, vector<64x128xf32> -> vector<64x128xf32>
    %169 = vector.broadcast %167 : vector<1x128xf32> to vector<64x128xf32>
    %170 = arith.addf %168, %169 : vector<64x128xf32>
    %c1 = arith.constant 1 : index
    %c0_48 = arith.constant 0 : index
    %c0_49 = arith.constant 0 : index
    %171 = vector.load %arg7[%c1, %c0_48, %c0_49] : memref<2x8x32xf32, #tpu.memory_space<vmem>>, vector<1x8x32xf32>
    %172 = vector.shape_cast %171 : vector<1x8x32xf32> to vector<8x32xf32>
    %c1_50 = arith.constant 1 : index
    %c0_51 = arith.constant 0 : index
    %c0_52 = arith.constant 0 : index
    %173 = vector.load %arg8[%c1_50, %c0_51, %c0_52] : memref<2x8x32xf32, #tpu.memory_space<vmem>>, vector<1x8x32xf32>
    %174 = vector.shape_cast %173 : vector<1x8x32xf32> to vector<8x32xf32>
    %175 = vector.extract_strided_slice %170 {offsets = [0, 0], sizes = [8, 128], strides = [1, 1]} : vector<64x128xf32> to vector<8x128xf32>
    %cst_53 = arith.constant dense<0.000000e+00> : vector<8x128xf32>
    %176 = tpu.matmul %172, %166, %cst_53 {dimension_numbers = #tpu.dot_dimension_numbers<[1], [0], [0], [1], [0, 0, 1, 1], [], []>} : vector<8x32xf32>, vector<32x128xf32>, vector<8x128xf32> -> vector<8x128xf32>
    %177 = arith.addf %175, %176 : vector<8x128xf32>
    %178 = arith.negf %177 : vector<8x128xf32>
    %179 = math.exp %178 : vector<8x128xf32>
    %cst_54 = arith.constant 1.000000e+00 : f32
    %180 = vector.broadcast %cst_54 : f32 to vector<8x128xf32>
    %181 = arith.addf %180, %179 : vector<8x128xf32>
    %182 = arith.divf %180, %181 : vector<8x128xf32>
    %183 = vector.extract_strided_slice %182 {offsets = [0, 0], sizes = [8, 32], strides = [1, 1]} : vector<8x128xf32> to vector<8x32xf32>
    %184 = vector.extract_strided_slice %182 {offsets = [0, 32], sizes = [8, 32], strides = [1, 1]} : vector<8x128xf32> to vector<8x32xf32>
    %185 = vector.extract_strided_slice %182 {offsets = [0, 96], sizes = [8, 32], strides = [1, 1]} : vector<8x128xf32> to vector<8x32xf32>
    %186 = vector.extract_strided_slice %177 {offsets = [0, 64], sizes = [8, 32], strides = [1, 1]} : vector<8x128xf32> to vector<8x32xf32>
    %187 = math.tanh %186 : vector<8x32xf32>
    %188 = arith.mulf %184, %174 : vector<8x32xf32>
    %189 = arith.mulf %183, %187 : vector<8x32xf32>
    %190 = arith.addf %188, %189 : vector<8x32xf32>
    %191 = math.tanh %190 : vector<8x32xf32>
    %192 = arith.mulf %185, %191 : vector<8x32xf32>
    %193 = vector.extract_strided_slice %170 {offsets = [8, 0], sizes = [8, 128], strides = [1, 1]} : vector<64x128xf32> to vector<8x128xf32>
    %cst_55 = arith.constant dense<0.000000e+00> : vector<8x128xf32>
    %194 = tpu.matmul %192, %166, %cst_55 {dimension_numbers = #tpu.dot_dimension_numbers<[1], [0], [0], [1], [0, 0, 1, 1], [], []>} : vector<8x32xf32>, vector<32x128xf32>, vector<8x128xf32> -> vector<8x128xf32>
    %195 = arith.addf %193, %194 : vector<8x128xf32>
    %196 = arith.negf %195 : vector<8x128xf32>
    %197 = math.exp %196 : vector<8x128xf32>
    %cst_56 = arith.constant 1.000000e+00 : f32
    %198 = vector.broadcast %cst_56 : f32 to vector<8x128xf32>
    %199 = arith.addf %198, %197 : vector<8x128xf32>
    %200 = arith.divf %198, %199 : vector<8x128xf32>
    %201 = vector.extract_strided_slice %200 {offsets = [0, 0], sizes = [8, 32], strides = [1, 1]} : vector<8x128xf32> to vector<8x32xf32>
    %202 = vector.extract_strided_slice %200 {offsets = [0, 32], sizes = [8, 32], strides = [1, 1]} : vector<8x128xf32> to vector<8x32xf32>
    %203 = vector.extract_strided_slice %200 {offsets = [0, 96], sizes = [8, 32], strides = [1, 1]} : vector<8x128xf32> to vector<8x32xf32>
    %204 = vector.extract_strided_slice %195 {offsets = [0, 64], sizes = [8, 32], strides = [1, 1]} : vector<8x128xf32> to vector<8x32xf32>
    %205 = math.tanh %204 : vector<8x32xf32>
    %206 = arith.mulf %202, %190 : vector<8x32xf32>
    %207 = arith.mulf %201, %205 : vector<8x32xf32>
    %208 = arith.addf %206, %207 : vector<8x32xf32>
    %209 = math.tanh %208 : vector<8x32xf32>
    %210 = arith.mulf %203, %209 : vector<8x32xf32>
    %211 = vector.extract_strided_slice %170 {offsets = [16, 0], sizes = [8, 128], strides = [1, 1]} : vector<64x128xf32> to vector<8x128xf32>
    %cst_57 = arith.constant dense<0.000000e+00> : vector<8x128xf32>
    %212 = tpu.matmul %210, %166, %cst_57 {dimension_numbers = #tpu.dot_dimension_numbers<[1], [0], [0], [1], [0, 0, 1, 1], [], []>} : vector<8x32xf32>, vector<32x128xf32>, vector<8x128xf32> -> vector<8x128xf32>
    %213 = arith.addf %211, %212 : vector<8x128xf32>
    %214 = arith.negf %213 : vector<8x128xf32>
    %215 = math.exp %214 : vector<8x128xf32>
    %cst_58 = arith.constant 1.000000e+00 : f32
    %216 = vector.broadcast %cst_58 : f32 to vector<8x128xf32>
    %217 = arith.addf %216, %215 : vector<8x128xf32>
    %218 = arith.divf %216, %217 : vector<8x128xf32>
    %219 = vector.extract_strided_slice %218 {offsets = [0, 0], sizes = [8, 32], strides = [1, 1]} : vector<8x128xf32> to vector<8x32xf32>
    %220 = vector.extract_strided_slice %218 {offsets = [0, 32], sizes = [8, 32], strides = [1, 1]} : vector<8x128xf32> to vector<8x32xf32>
    %221 = vector.extract_strided_slice %218 {offsets = [0, 96], sizes = [8, 32], strides = [1, 1]} : vector<8x128xf32> to vector<8x32xf32>
    %222 = vector.extract_strided_slice %213 {offsets = [0, 64], sizes = [8, 32], strides = [1, 1]} : vector<8x128xf32> to vector<8x32xf32>
    %223 = math.tanh %222 : vector<8x32xf32>
    %224 = arith.mulf %220, %208 : vector<8x32xf32>
    %225 = arith.mulf %219, %223 : vector<8x32xf32>
    %226 = arith.addf %224, %225 : vector<8x32xf32>
    %227 = math.tanh %226 : vector<8x32xf32>
    %228 = arith.mulf %221, %227 : vector<8x32xf32>
    %229 = vector.extract_strided_slice %170 {offsets = [24, 0], sizes = [8, 128], strides = [1, 1]} : vector<64x128xf32> to vector<8x128xf32>
    %cst_59 = arith.constant dense<0.000000e+00> : vector<8x128xf32>
    %230 = tpu.matmul %228, %166, %cst_59 {dimension_numbers = #tpu.dot_dimension_numbers<[1], [0], [0], [1], [0, 0, 1, 1], [], []>} : vector<8x32xf32>, vector<32x128xf32>, vector<8x128xf32> -> vector<8x128xf32>
    %231 = arith.addf %229, %230 : vector<8x128xf32>
    %232 = arith.negf %231 : vector<8x128xf32>
    %233 = math.exp %232 : vector<8x128xf32>
    %cst_60 = arith.constant 1.000000e+00 : f32
    %234 = vector.broadcast %cst_60 : f32 to vector<8x128xf32>
    %235 = arith.addf %234, %233 : vector<8x128xf32>
    %236 = arith.divf %234, %235 : vector<8x128xf32>
    %237 = vector.extract_strided_slice %236 {offsets = [0, 0], sizes = [8, 32], strides = [1, 1]} : vector<8x128xf32> to vector<8x32xf32>
    %238 = vector.extract_strided_slice %236 {offsets = [0, 32], sizes = [8, 32], strides = [1, 1]} : vector<8x128xf32> to vector<8x32xf32>
    %239 = vector.extract_strided_slice %236 {offsets = [0, 96], sizes = [8, 32], strides = [1, 1]} : vector<8x128xf32> to vector<8x32xf32>
    %240 = vector.extract_strided_slice %231 {offsets = [0, 64], sizes = [8, 32], strides = [1, 1]} : vector<8x128xf32> to vector<8x32xf32>
    %241 = math.tanh %240 : vector<8x32xf32>
    %242 = arith.mulf %238, %226 : vector<8x32xf32>
    %243 = arith.mulf %237, %241 : vector<8x32xf32>
    %244 = arith.addf %242, %243 : vector<8x32xf32>
    %245 = math.tanh %244 : vector<8x32xf32>
    %246 = arith.mulf %239, %245 : vector<8x32xf32>
    %247 = vector.extract_strided_slice %170 {offsets = [32, 0], sizes = [8, 128], strides = [1, 1]} : vector<64x128xf32> to vector<8x128xf32>
    %cst_61 = arith.constant dense<0.000000e+00> : vector<8x128xf32>
    %248 = tpu.matmul %246, %166, %cst_61 {dimension_numbers = #tpu.dot_dimension_numbers<[1], [0], [0], [1], [0, 0, 1, 1], [], []>} : vector<8x32xf32>, vector<32x128xf32>, vector<8x128xf32> -> vector<8x128xf32>
    %249 = arith.addf %247, %248 : vector<8x128xf32>
    %250 = arith.negf %249 : vector<8x128xf32>
    %251 = math.exp %250 : vector<8x128xf32>
    %cst_62 = arith.constant 1.000000e+00 : f32
    %252 = vector.broadcast %cst_62 : f32 to vector<8x128xf32>
    %253 = arith.addf %252, %251 : vector<8x128xf32>
    %254 = arith.divf %252, %253 : vector<8x128xf32>
    %255 = vector.extract_strided_slice %254 {offsets = [0, 0], sizes = [8, 32], strides = [1, 1]} : vector<8x128xf32> to vector<8x32xf32>
    %256 = vector.extract_strided_slice %254 {offsets = [0, 32], sizes = [8, 32], strides = [1, 1]} : vector<8x128xf32> to vector<8x32xf32>
    %257 = vector.extract_strided_slice %254 {offsets = [0, 96], sizes = [8, 32], strides = [1, 1]} : vector<8x128xf32> to vector<8x32xf32>
    %258 = vector.extract_strided_slice %249 {offsets = [0, 64], sizes = [8, 32], strides = [1, 1]} : vector<8x128xf32> to vector<8x32xf32>
    %259 = math.tanh %258 : vector<8x32xf32>
    %260 = arith.mulf %256, %244 : vector<8x32xf32>
    %261 = arith.mulf %255, %259 : vector<8x32xf32>
    %262 = arith.addf %260, %261 : vector<8x32xf32>
    %263 = math.tanh %262 : vector<8x32xf32>
    %264 = arith.mulf %257, %263 : vector<8x32xf32>
    %265 = vector.extract_strided_slice %170 {offsets = [40, 0], sizes = [8, 128], strides = [1, 1]} : vector<64x128xf32> to vector<8x128xf32>
    %cst_63 = arith.constant dense<0.000000e+00> : vector<8x128xf32>
    %266 = tpu.matmul %264, %166, %cst_63 {dimension_numbers = #tpu.dot_dimension_numbers<[1], [0], [0], [1], [0, 0, 1, 1], [], []>} : vector<8x32xf32>, vector<32x128xf32>, vector<8x128xf32> -> vector<8x128xf32>
    %267 = arith.addf %265, %266 : vector<8x128xf32>
    %268 = arith.negf %267 : vector<8x128xf32>
    %269 = math.exp %268 : vector<8x128xf32>
    %cst_64 = arith.constant 1.000000e+00 : f32
    %270 = vector.broadcast %cst_64 : f32 to vector<8x128xf32>
    %271 = arith.addf %270, %269 : vector<8x128xf32>
    %272 = arith.divf %270, %271 : vector<8x128xf32>
    %273 = vector.extract_strided_slice %272 {offsets = [0, 0], sizes = [8, 32], strides = [1, 1]} : vector<8x128xf32> to vector<8x32xf32>
    %274 = vector.extract_strided_slice %272 {offsets = [0, 32], sizes = [8, 32], strides = [1, 1]} : vector<8x128xf32> to vector<8x32xf32>
    %275 = vector.extract_strided_slice %272 {offsets = [0, 96], sizes = [8, 32], strides = [1, 1]} : vector<8x128xf32> to vector<8x32xf32>
    %276 = vector.extract_strided_slice %267 {offsets = [0, 64], sizes = [8, 32], strides = [1, 1]} : vector<8x128xf32> to vector<8x32xf32>
    %277 = math.tanh %276 : vector<8x32xf32>
    %278 = arith.mulf %274, %262 : vector<8x32xf32>
    %279 = arith.mulf %273, %277 : vector<8x32xf32>
    %280 = arith.addf %278, %279 : vector<8x32xf32>
    %281 = math.tanh %280 : vector<8x32xf32>
    %282 = arith.mulf %275, %281 : vector<8x32xf32>
    %283 = vector.extract_strided_slice %170 {offsets = [48, 0], sizes = [8, 128], strides = [1, 1]} : vector<64x128xf32> to vector<8x128xf32>
    %cst_65 = arith.constant dense<0.000000e+00> : vector<8x128xf32>
    %284 = tpu.matmul %282, %166, %cst_65 {dimension_numbers = #tpu.dot_dimension_numbers<[1], [0], [0], [1], [0, 0, 1, 1], [], []>} : vector<8x32xf32>, vector<32x128xf32>, vector<8x128xf32> -> vector<8x128xf32>
    %285 = arith.addf %283, %284 : vector<8x128xf32>
    %286 = arith.negf %285 : vector<8x128xf32>
    %287 = math.exp %286 : vector<8x128xf32>
    %cst_66 = arith.constant 1.000000e+00 : f32
    %288 = vector.broadcast %cst_66 : f32 to vector<8x128xf32>
    %289 = arith.addf %288, %287 : vector<8x128xf32>
    %290 = arith.divf %288, %289 : vector<8x128xf32>
    %291 = vector.extract_strided_slice %290 {offsets = [0, 0], sizes = [8, 32], strides = [1, 1]} : vector<8x128xf32> to vector<8x32xf32>
    %292 = vector.extract_strided_slice %290 {offsets = [0, 32], sizes = [8, 32], strides = [1, 1]} : vector<8x128xf32> to vector<8x32xf32>
    %293 = vector.extract_strided_slice %290 {offsets = [0, 96], sizes = [8, 32], strides = [1, 1]} : vector<8x128xf32> to vector<8x32xf32>
    %294 = vector.extract_strided_slice %285 {offsets = [0, 64], sizes = [8, 32], strides = [1, 1]} : vector<8x128xf32> to vector<8x32xf32>
    %295 = math.tanh %294 : vector<8x32xf32>
    %296 = arith.mulf %292, %280 : vector<8x32xf32>
    %297 = arith.mulf %291, %295 : vector<8x32xf32>
    %298 = arith.addf %296, %297 : vector<8x32xf32>
    %299 = math.tanh %298 : vector<8x32xf32>
    %300 = arith.mulf %293, %299 : vector<8x32xf32>
    %301 = vector.extract_strided_slice %170 {offsets = [56, 0], sizes = [8, 128], strides = [1, 1]} : vector<64x128xf32> to vector<8x128xf32>
    %cst_67 = arith.constant dense<0.000000e+00> : vector<8x128xf32>
    %302 = tpu.matmul %300, %166, %cst_67 {dimension_numbers = #tpu.dot_dimension_numbers<[1], [0], [0], [1], [0, 0, 1, 1], [], []>} : vector<8x32xf32>, vector<32x128xf32>, vector<8x128xf32> -> vector<8x128xf32>
    %303 = arith.addf %301, %302 : vector<8x128xf32>
    %304 = arith.negf %303 : vector<8x128xf32>
    %305 = math.exp %304 : vector<8x128xf32>
    %cst_68 = arith.constant 1.000000e+00 : f32
    %306 = vector.broadcast %cst_68 : f32 to vector<8x128xf32>
    %307 = arith.addf %306, %305 : vector<8x128xf32>
    %308 = arith.divf %306, %307 : vector<8x128xf32>
    %309 = vector.extract_strided_slice %308 {offsets = [0, 0], sizes = [8, 32], strides = [1, 1]} : vector<8x128xf32> to vector<8x32xf32>
    %310 = vector.extract_strided_slice %308 {offsets = [0, 32], sizes = [8, 32], strides = [1, 1]} : vector<8x128xf32> to vector<8x32xf32>
    %311 = vector.extract_strided_slice %308 {offsets = [0, 96], sizes = [8, 32], strides = [1, 1]} : vector<8x128xf32> to vector<8x32xf32>
    %312 = vector.extract_strided_slice %303 {offsets = [0, 64], sizes = [8, 32], strides = [1, 1]} : vector<8x128xf32> to vector<8x32xf32>
    %313 = math.tanh %312 : vector<8x32xf32>
    %314 = arith.mulf %310, %298 : vector<8x32xf32>
    %315 = arith.mulf %309, %313 : vector<8x32xf32>
    %316 = arith.addf %314, %315 : vector<8x32xf32>
    %317 = math.tanh %316 : vector<8x32xf32>
    %318 = arith.mulf %311, %317 : vector<8x32xf32>
    %c0_69 = arith.constant 0 : index
    %c0_70 = arith.constant 0 : index
    %319 = vector.load %arg9[%c0_69, %c0_70] : memref<32x2xf32, #tpu.memory_space<vmem>>, vector<32x2xf32>
    %cst_71 = arith.constant dense<0.000000e+00> : vector<8x2xf32>
    %320 = tpu.matmul %318, %319, %cst_71 {dimension_numbers = #tpu.dot_dimension_numbers<[1], [0], [0], [1], [0, 0, 1, 1], [], []>} : vector<8x32xf32>, vector<32x2xf32>, vector<8x2xf32> -> vector<8x2xf32>
    %c0_72 = arith.constant 0 : index
    %c0_73 = arith.constant 0 : index
    %321 = vector.load %arg10[%c0_72, %c0_73] : memref<1x2xf32, #tpu.memory_space<vmem>>, vector<1x2xf32>
    %322 = vector.broadcast %321 : vector<1x2xf32> to vector<8x2xf32>
    %323 = arith.addf %320, %322 : vector<8x2xf32>
    %c0_74 = arith.constant 0 : index
    %c0_75 = arith.constant 0 : index
    %324 = vector.load %arg11[%c0_74, %c0_75] : memref<8x2xf32, #tpu.memory_space<vmem>>, vector<8x2xf32>
    tpu.vector_store %arg11[%c0_74, %c0_75], %323 {strides = array<i32>} : memref<8x2xf32, #tpu.memory_space<vmem>>, vector<8x2xf32>,
    return
  }
}

</mosaic_0001>

<bundles_post_ra>
// kernel: mymodel_forward.1
= control target key start
LH: loop header
LB: loop body
LE: loop exit
PB: predicated region body
PF: predicated region fallthrough
CT: control target
= control target key end

     0   :  { %v2579_v0 = vmov 0.0   ;;  %vm2580_vm0 = vmmov 0   ;;  %vm59_vm1 = vcmask 130048   ;;  %vm191_vm2 = vcmask 261120   ;;  %s2581_s16 = smov 64   ;;  %s2582_s19 = smov 32   ;;  %s3085_s1 = inlined_call_operand.vmem [shape: f32[16,128], index: 1, kind: input, shape index: {}]   ;;  %s3086_s2 = inlined_call_operand.vmem [shape: f32[32,128], index: 2, kind: input, shape index: {}]   ;;  %s3087_s0 = inlined_call_operand.vmem [shape: f32[8,8,16], index: 0, kind: input, shape index: {}]   ;;  %s3088_s7 = inlined_call_operand.vmem [shape: f32[2,8,32], index: 7, kind: input, shape index: {}]   ;;  %s3089_s3 = inlined_call_operand.vmem [shape: f32[1,128], index: 3, kind: input, shape index: {}]   ;;  %s3090_s8 = inlined_call_operand.vmem [shape: f32[2,8,32], index: 8, kind: input, shape index: {}]   ;;  %s3091_s4 = inlined_call_operand.vmem [shape: f32[32,128], index: 4, kind: input, shape index: {}]   ;;  %s3092_s5 = inlined_call_operand.vmem [shape: f32[32,128], index: 5, kind: input, shape index: {}]   ;;  %s3093_s6 = inlined_call_operand.vmem [shape: f32[1,128], index: 6, kind: input, shape index: {}]   ;;  %s3094_s9 = inlined_call_operand.vmem [shape: f32[32,2], index: 9, kind: input, shape index: {}]   ;;  %s3095_s10 = inlined_call_operand.vmem [shape: f32[1,2], index: 10, kind: input, shape index: {}]   ;;  %s3096_s11 = inlined_call_operand.vmem [shape: f32[8,2], index: 11, kind: output, shape index: {}]  }
   0x1   :  { %2240 = vmatprep.subr.mxu1 %v2579_v0  ;;  %v47_v1 = vld [vmem:[%s3085_s1 + $0x8] sm:$0xff]  ;;  %v2650_v2 = vld [vmem:[%s3086_s2 + $0x18] sm:$0xff]  ;;  %v46_v3 = vld [vmem:[%s3085_s1] sm:$0xff]  ;;  %2248 = vmatprep.mubr.msk.f32.mxu1 %vm2580_vm0, %v2579_v0  ;;  %vm2057_vm3 = vcmask 15360  }
   0x2   :  { %2224 = vmatprep.subr.mxu0 %v47_v1  ;;  %2241 = vmatpush3.msra.mxu1 %v2650_v2  ;;  %v2661_v4 = vld [vmem:[%s3086_s2 + $0x10] sm:$0xff]  ;;  %v38_v5 = vld [vmem:[%s3087_s0] sm:$0xff]  ;;  %v39_v6 = vld [vmem:[%s3087_s0 + $0x8] sm:$0xff] }
   0x3   :  { %2225 = vmatpush3.msra.mxu0 %v47_v1  ;;  %2242 = vmatprep.subr.mxu1 %v2579_v0  ;;  %v2674_v7 = vld [vmem:[%s3086_s2 + $0x8] sm:$0xff]  ;;  %v2682_v8 = vld [vmem:[%s3086_s2] sm:$0xff]  ;;  %v40_v47 = vld [vmem:[%s3087_s0 + $0x10] sm:$0xff] }
   0x4   :  { %2226 = vmatprep.subr.mxu0 %v46_v3  ;;  %2243 = vmatpush3.msra.mxu1 %v2661_v4  ;;  %v189_v9 = vld [vmem:[%s3088_s7] sm:$0xff]  ;;  %v41_v48 = vld [vmem:[%s3087_s0 + $0x18] sm:$0xff]  ;;  %v43_v50 = vld [vmem:[%s3087_s0 + $0x28] sm:$0xff] }
   0x5   :  { %2227 = vmatpush3.msra.mxu0 %v46_v3  ;;  %2228 = vmatprep.mubr.msk.f32.mxu0 %vm59_vm1, %v38_v5  ;;  %v2714_v11 = vld [vmem:[%s3089_s3] ss:$0 sm:$0xff]  ;;  %v44_v51 = vld [vmem:[%s3087_s0 + $0x30] sm:$0xff]  ;;  %v45_v52 = vld [vmem:[%s3087_s0 + $0x38] sm:$0xff] }
   0x6   :  { %2244 = vmatprep.subr.mxu1 %v2579_v0  ;;  %2229 = vmatmul.mubr.msk.f32.vlgmr.msra.gmra.mxu0 %vm59_vm1, %v39_v6  ;;  %v190_v18 = vld [vmem:[%s3090_s8] sm:$0xff] }
   0x7   :  { %2245 = vmatpush3.msra.mxu1 %v2674_v7  ;;  %2262 = vmatprep.subr.mxu0 %v2579_v0  ;;  %v42_v49 = vld [vmem:[%s3087_s0 + $0x20] sm:$0xff] }
   0x8   :  { %2246 = vmatprep.subr.mxu1 %v2579_v0  ;;  %2263 = vmatpush3.msra.mxu0 %v2650_v2 }
   0x9   :  { %2247 = vmatpush3.msra.mxu1 %v2682_v8  ;;  %2264 = vmatprep.subr.mxu0 %v2579_v0 }
   0xa   :  { %2249 = vmatmul.mubr.msk.f32.vlgmr.msra.gmra.mxu1 %vm191_vm2, %v189_v9  ;;  %2251 = vmatprep.subr.mxu1 %v2579_v0 }
   0xb   :  { %2252 = vmatpush3.msra.mxu1 %v2650_v2  ;;  %2259 = vmatprep.mubr.msk.f32.mxu1 %vm2580_vm0, %v2579_v0 }
   0xc   :  { %2253 = vmatprep.subr.mxu1 %v2579_v0  ;;  %2265 = vmatpush3.msra.mxu0 %v2661_v4 }
   0xd   :  { %2254 = vmatpush3.msra.mxu1 %v2661_v4  ;;  %2266 = vmatprep.subr.mxu0 %v2579_v0 }
   0xe   :  { %2255 = vmatprep.subr.mxu1 %v2579_v0  ;;  %2267 = vmatpush3.msra.mxu0 %v2674_v7 }
   0xf   :  { %2256 = vmatpush3.msra.mxu1 %v2674_v7  ;;  %2268 = vmatprep.subr.mxu0 %v2579_v0 }
  0x10   :  { %2257 = vmatprep.subr.mxu1 %v2579_v0  ;;  %2269 = vmatpush3.msra.mxu0 %v2682_v8 }
  0x11   :  { %2258 = vmatpush3.msra.mxu1 %v2682_v8  ;;  %2284 = vmatprep.subr.mxu0 %v2579_v0 }
  0x12   :  { %2273 = vmatprep.subr.mxu1 %v2579_v0  ;;  %2231 = vmatprep.mubr.msk.f32.mxu0 %vm59_vm1, %v40_v47 }
  0x13   :  { %2232 = vmatmul.mubr.msk.f32.gmra.mxu0 %vm59_vm1, %v41_v48 }
  0x14   :  { %2234 = vmatprep.mubr.msk.f32.mxu0 %vm59_vm1, %v42_v49 }
  0x17   :  { %2235 = vmatmul.mubr.msk.f32.gmra.mxu0 %vm59_vm1, %v43_v50 }
  0x18   :  { %2237 = vmatprep.mubr.msk.f32.mxu0 %vm59_vm1, %v44_v51 }
  0x1b   :  { %2238 = vmatmul.mubr.msk.f32.gmra.mxu0 %vm59_vm1, %v45_v52 }
  0x1c   :  { %2270 = vmatprep.mubr.msk.f32.mxu0 %vm2580_vm0, %v2579_v0 }
  0xc6   :  { %v2230_v10 = vpop.f32.mrf.mxu0 }
  0xc7   :  { %v156_v33 = vadd.f32 %v2230_v10, %v2714_v11 }
  0xc8   :  { %v150_v12 = vpop.f32.mrf.mxu0 }
  0xc9   :  { %v151_v13 = vadd.f32 %v2714_v11, %v150_v12 }
  0xca   :  { %v261_v14 = vpop.f32.mrf.mxu1 }
  0xcb   :  { %v265_v15 = vadd.f32 %v261_v14, %v151_v13 }
  0xcc   :  { %v2250_v16 = vpop.f32.mrf.mxu1 }
  0xcd   :  { %2451 = vtanh.f32 %v265_v15  ;;  %v2073_v19 = vmul.f32 -1.442695, %v265_v15 }
  0xcf   :  { %2453 = vpow2.f32 %v2073_v19 }
  0xd3   :  { %v2233_v57 = vpop.f32.mrf.mxu0 }
  0xd5   :  { %v160_v58 = vpop.f32.mrf.mxu0 }
  0xd6   :  { %v161_v63 = vadd.f32 %v2714_v11, %v160_v58 }
  0xd7   :  { %v2780_v59 = vpop.f32.mrf.mxu0 }
  0xd9   :  { %v2782_v60 = vpop.f32.mrf.mxu0 }
  0xda   :  { %v2452_v17 = vpop.eup %2451 }
  0xdb   :  { %279 = vrot.lane.b32.xlu0 %v2452_v17, %s2581_s16  ;;  %v2784_v61 = vpop.f32.mrf.mxu0 }
  0xdc   :  { %v2454_v20 = vpop.eup %2453 }
  0xdd   :  { %v269_v21 = vadd.f32 1.0, %v2454_v20  ;;  %v2786_v62 = vpop.f32.mrf.mxu0 }
  0xdf   :  { %274 = vrot.lane.b32.xlu0 %v190_v18, %s2582_s19  ;;  %2455 = vrcp.f32 %v269_v21 }
  0xec   :  { %v2456_v22 = vpop.eup %2455 }
 0x14d   :  { %v280_v23 = vpop.permute.xlu0 %279 }
 0x14e   :  { %v282_v24 = vmul.f32 %v2456_v22, %v280_v23  ;;  %v166_v23 = vadd.f32 %v2233_v57, %v2714_v11 }
 0x150   :  { %284 = vrot.lane.b32.xlu1 %v282_v24, %s2582_s19 }
 0x151   :  { %v275_v25 = vpop.permute.xlu0 %274 }
 0x152   :  { %v277_v26 = vmul.f32 %v2456_v22, %v275_v25 }
 0x1c2   :  { %v285_v27 = vpop.permute.xlu1 %284 }
 0x1c3   :  { %v287_v28 = vadd.f32 %v285_v27, %v277_v26 }
 0x1c5   :  { %2457 = vtanh.f32 %v287_v28 }
 0x1d2   :  { %v2458_v29 = vpop.eup %2457 }
 0x1d3   :  { %290 = vrot.lane.b32.xlu1 %v2458_v29, %s2581_s16 }
 0x245   :  { %v291_v30 = vpop.permute.xlu1 %290 }
 0x246   :  { %v293_v31 = vmul.f32 %v2456_v22, %v291_v30 }
 0x248   :  { %295 = vrot.lane.b32.xlu0 %v293_v31, %s2582_s19 }
 0x2ba   :  { %v296_v32 = vpop.permute.xlu0 %295 }
 0x2bb   :  { %298 = vst.msk [vmem:[#allocation2] sm:$0xff] %vm191_vm2, %v296_v32  ;;  %2260 = vmatmul.mubr.msk.f32.vlgmr.msra.gmra.mxu1 %vm191_vm2, %v296_v32 }
 0x2bc   :  { %2274 = vmatpush3.msra.mxu1 %v2650_v2  ;;  %2281 = vmatprep.mubr.msk.f32.mxu1 %vm2580_vm0, %v2579_v0 }
 0x2bd   :  { %2275 = vmatprep.subr.mxu1 %v2579_v0 }
 0x2be   :  { %2276 = vmatpush3.msra.mxu1 %v2661_v4 }
 0x2bf   :  { %2277 = vmatprep.subr.mxu1 %v2579_v0 }
 0x2c0   :  { %2278 = vmatpush3.msra.mxu1 %v2674_v7 }
 0x2c1   :  { %2279 = vmatprep.subr.mxu1 %v2579_v0 }
 0x2c2   :  { %2280 = vmatpush3.msra.mxu1 %v2682_v8 }
 0x2c3   :  { %2295 = vmatprep.subr.mxu1 %v2579_v0 }
 0x37b   :  { %v367_v34 = vpop.f32.mrf.mxu1 }
 0x37c   :  { %v371_v35 = vadd.f32 %v367_v34, %v156_v33 }
 0x37d   :  { %v2261_v36 = vpop.f32.mrf.mxu1 }
 0x37e   :  { %2459 = vtanh.f32 %v371_v35  ;;  %v2075_v38 = vmul.f32 -1.442695, %v371_v35 }
 0x380   :  { %2461 = vpow2.f32 %v2075_v38 }
 0x38b   :  { %v2460_v37 = vpop.eup %2459 }
 0x38c   :  { %381 = vrot.lane.b32.xlu1 %v2460_v37, %s2581_s16 }
 0x38d   :  { %v2462_v39 = vpop.eup %2461 }
 0x38e   :  { %v375_v40 = vadd.f32 1.0, %v2462_v39 }
 0x390   :  { %2463 = vrcp.f32 %v375_v40 }
 0x39d   :  { %v2464_v41 = vpop.eup %2463 }
 0x39e   :  { %v379_v44 = vmul.f32 %v2464_v41, %v287_v28 }
 0x3fe   :  { %v382_v42 = vpop.permute.xlu1 %381 }
 0x3ff   :  { %v384_v43 = vmul.f32 %v2464_v41, %v382_v42 }
 0x401   :  { %386 = vrot.lane.b32.xlu0 %v384_v43, %s2582_s19 }
 0x473   :  { %v387_v45 = vpop.permute.xlu0 %386 }
 0x474   :  { %v389_v46 = vadd.f32 %v387_v45, %v379_v44 }
 0x476   :  { %2465 = vtanh.f32 %v389_v46 }
 0x483   :  { %v2466_v53 = vpop.eup %2465 }
 0x484   :  { %392 = vrot.lane.b32.xlu1 %v2466_v53, %s2581_s16 }
 0x4f6   :  { %v393_v54 = vpop.permute.xlu1 %392 }
 0x4f7   :  { %v395_v55 = vmul.f32 %v2464_v41, %v393_v54  ;;  %v171_v41 = vadd.f32 %v2714_v11, %v2782_v60 }
 0x4f9   :  { %397 = vrot.lane.b32.xlu0 %v395_v55, %s2582_s19 }
 0x56b   :  { %v398_v56 = vpop.permute.xlu0 %397 }
 0x56c   :  { %400 = vst.msk [vmem:[#allocation2 + $0x8] sm:$0xff] %vm191_vm2, %v398_v56  ;;  %2271 = vmatmul.mubr.msk.f32.vlgmr.msra.gmra.mxu0 %vm191_vm2, %v398_v56 }
 0x56d   :  { %2285 = vmatpush3.msra.mxu0 %v2650_v2  ;;  %2292 = vmatprep.mubr.msk.f32.mxu0 %vm2580_vm0, %v2579_v0 }
 0x56e   :  { %2286 = vmatprep.subr.mxu0 %v2579_v0 }
 0x56f   :  { %2287 = vmatpush3.msra.mxu0 %v2661_v4 }
 0x570   :  { %2288 = vmatprep.subr.mxu0 %v2579_v0 }
 0x571   :  { %2289 = vmatpush3.msra.mxu0 %v2674_v7 }
 0x572   :  { %2290 = vmatprep.subr.mxu0 %v2579_v0 }
 0x573   :  { %2291 = vmatpush3.msra.mxu0 %v2682_v8 }
 0x574   :  { %2306 = vmatprep.subr.mxu0 %v2579_v0 }
 0x62c   :  { %v469_v1 = vpop.f32.mrf.mxu0 }
 0x62d   :  { %v473_v3 = vadd.f32 %v469_v1, %v161_v63 }
 0x62e   :  { %v2272_v5 = vpop.f32.mrf.mxu0 }
 0x62f   :  { %2467 = vtanh.f32 %v473_v3  ;;  %v2077_v9 = vmul.f32 -1.442695, %v473_v3 }
 0x631   :  { %2469 = vpow2.f32 %v2077_v9 }
 0x63c   :  { %v2468_v6 = vpop.eup %2467 }
 0x63d   :  { %483 = vrot.lane.b32.xlu1 %v2468_v6, %s2581_s16 }
 0x63e   :  { %v2470_v10 = vpop.eup %2469 }
 0x63f   :  { %v477_v12 = vadd.f32 1.0, %v2470_v10 }
 0x641   :  { %2471 = vrcp.f32 %v477_v12 }
 0x64e   :  { %v2472_v13 = vpop.eup %2471 }
 0x64f   :  { %v481_v16 = vmul.f32 %v2472_v13, %v389_v46 }
 0x6af   :  { %v484_v14 = vpop.permute.xlu1 %483 }
 0x6b0   :  { %v486_v15 = vmul.f32 %v2472_v13, %v484_v14 }
 0x6b2   :  { %488 = vrot.lane.b32.xlu0 %v486_v15, %s2582_s19 }
 0x724   :  { %v489_v17 = vpop.permute.xlu0 %488 }
 0x725   :  { %v491_v18 = vadd.f32 %v489_v17, %v481_v16 }
 0x727   :  { %2473 = vtanh.f32 %v491_v18 }
 0x734   :  { %v2474_v19 = vpop.eup %2473 }
 0x735   :  { %494 = vrot.lane.b32.xlu1 %v2474_v19, %s2581_s16  ;;  %v1013_v19 = vld [vmem:[#allocation2] sm:$0xff] }
 0x7a7   :  { %v495_v20 = vpop.permute.xlu1 %494 }
 0x7a8   :  { %v497_v21 = vmul.f32 %v2472_v13, %v495_v20  ;;  %v1024_v13 = vld [vmem:[%s3091_s4 + $0x18] sm:$0xff]  ;;  %v1022_v20 = vld [vmem:[%s3091_s4 + $0x8] sm:$0xff] }
 0x7aa   :  { %499 = vrot.lane.b32.xlu0 %v497_v21, %s2582_s19  ;;  %v1021_v21 = vld [vmem:[%s3091_s4] sm:$0xff] }
 0x81c   :  { %v500_v22 = vpop.permute.xlu0 %499 }
 0x81d   :  { %502 = vst.msk [vmem:[#allocation2 + $0x10] sm:$0xff] %vm191_vm2, %v500_v22  ;;  %2282 = vmatmul.mubr.msk.f32.vlgmr.msra.gmra.mxu1 %vm191_vm2, %v500_v22  ;;  %v1014_v22 = vld [vmem:[#allocation2 + $0x8] sm:$0xff] }
 0x81e   :  { %2296 = vmatpush3.msra.mxu1 %v2650_v2  ;;  %2303 = vmatprep.mubr.msk.f32.mxu1 %vm2580_vm0, %v2579_v0 }
 0x81f   :  { %2297 = vmatprep.subr.mxu1 %v2579_v0 }
 0x820   :  { %2298 = vmatpush3.msra.mxu1 %v2661_v4 }
 0x821   :  { %2299 = vmatprep.subr.mxu1 %v2579_v0 }
 0x822   :  { %2300 = vmatpush3.msra.mxu1 %v2674_v7 }
 0x823   :  { %2301 = vmatprep.subr.mxu1 %v2579_v0 }
 0x824   :  { %2302 = vmatpush3.msra.mxu1 %v2682_v8 }
 0x825   :  { %2317 = vmatprep.subr.mxu1 %v2579_v0 }
 0x8dd   :  { %v571_v24 = vpop.f32.mrf.mxu1 }
 0x8de   :  { %v575_v25 = vadd.f32 %v571_v24, %v166_v23  ;;  %v1015_v23 = vld [vmem:[#allocation2 + $0x10] sm:$0xff] }
 0x8df   :  { %v2283_v26 = vpop.f32.mrf.mxu1 }
 0x8e0   :  { %2475 = vtanh.f32 %v575_v25  ;;  %v2079_v28 = vmul.f32 -1.442695, %v575_v25 }
 0x8e2   :  { %2477 = vpow2.f32 %v2079_v28 }
 0x8ed   :  { %v2476_v27 = vpop.eup %2475 }
 0x8ee   :  { %585 = vrot.lane.b32.xlu1 %v2476_v27, %s2581_s16  ;;  %v181_v27 = vadd.f32 %v2714_v11, %v2786_v62 }
 0x8ef   :  { %v2478_v29 = vpop.eup %2477 }
 0x8f0   :  { %v579_v30 = vadd.f32 1.0, %v2478_v29 }
 0x8f2   :  { %2479 = vrcp.f32 %v579_v30 }
 0x8ff   :  { %v2480_v31 = vpop.eup %2479 }
 0x900   :  { %v583_v34 = vmul.f32 %v2480_v31, %v491_v18  ;;  %v1023_v18 = vld [vmem:[%s3091_s4 + $0x10] sm:$0xff] }
 0x960   :  { %v586_v32 = vpop.permute.xlu1 %585 }
 0x961   :  { %v588_v33 = vmul.f32 %v2480_v31, %v586_v32 }
 0x963   :  { %590 = vrot.lane.b32.xlu0 %v588_v33, %s2582_s19 }
 0x9d5   :  { %v591_v35 = vpop.permute.xlu0 %590 }
 0x9d6   :  { %v593_v36 = vadd.f32 %v591_v35, %v583_v34 }
 0x9d8   :  { %2481 = vtanh.f32 %v593_v36 }
 0x9e5   :  { %v2482_v37 = vpop.eup %2481 }
 0x9e6   :  { %596 = vrot.lane.b32.xlu1 %v2482_v37, %s2581_s16 }
 0xa58   :  { %v597_v38 = vpop.permute.xlu1 %596 }
 0xa59   :  { %v599_v39 = vmul.f32 %v2480_v31, %v597_v38 }
 0xa5b   :  { %601 = vrot.lane.b32.xlu0 %v599_v39, %s2582_s19 }
 0xacd   :  { %v602_v40 = vpop.permute.xlu0 %601 }
 0xace   :  { %604 = vst.msk [vmem:[#allocation2 + $0x18] sm:$0xff] %vm191_vm2, %v602_v40  ;;  %2293 = vmatmul.mubr.msk.f32.vlgmr.msra.gmra.mxu0 %vm191_vm2, %v602_v40 }
 0xacf   :  { %2307 = vmatpush3.msra.mxu0 %v2650_v2  ;;  %2314 = vmatprep.mubr.msk.f32.mxu0 %vm2580_vm0, %v2579_v0 }
 0xad0   :  { %2308 = vmatprep.subr.mxu0 %v2579_v0 }
 0xad1   :  { %2309 = vmatpush3.msra.mxu0 %v2661_v4 }
 0xad2   :  { %2310 = vmatprep.subr.mxu0 %v2579_v0 }
 0xad3   :  { %2311 = vmatpush3.msra.mxu0 %v2674_v7 }
 0xad4   :  { %2312 = vmatprep.subr.mxu0 %v2579_v0 }
 0xad5   :  { %2313 = vmatpush3.msra.mxu0 %v2682_v8  ;;  %v1016_v24 = vld [vmem:[#allocation2 + $0x18] sm:$0xff] }
 0xad6   :  { %2328 = vmatprep.subr.mxu0 %v1024_v13 }
 0xb8e   :  { %v673_v42 = vpop.f32.mrf.mxu0 }
 0xb8f   :  { %v677_v43 = vadd.f32 %v673_v42, %v171_v41  ;;  %v2877_v41 = vld [vmem:[%s3092_s5 + $0x18] sm:$0xff]  ;;  %v2883_v42 = vld [vmem:[%s3092_s5 + $0x10] sm:$0xff] }
 0xb90   :  { %v2294_v44 = vpop.f32.mrf.mxu0 }
 0xb91   :  { %2483 = vtanh.f32 %v677_v43  ;;  %v2081_v46 = vmul.f32 -1.442695, %v677_v43  ;;  %v2890_v43 = vld [vmem:[%s3092_s5 + $0x8] sm:$0xff]  ;;  %v2897_v44 = vld [vmem:[%s3092_s5] sm:$0xff] }
 0xb93   :  { %2485 = vpow2.f32 %v2081_v46 }
 0xb9e   :  { %v2484_v45 = vpop.eup %2483 }
 0xb9f   :  { %687 = vrot.lane.b32.xlu1 %v2484_v45, %s2581_s16 }
 0xba0   :  { %v2486_v47 = vpop.eup %2485 }
 0xba1   :  { %v681_v48 = vadd.f32 1.0, %v2486_v47  ;;  %v2098_v47 = vld [vmem:[%s3090_s8 + $0x8] sm:$0xff] }
 0xba3   :  { %2487 = vrcp.f32 %v681_v48 }
 0xbb0   :  { %v2488_v49 = vpop.eup %2487 }
 0xbb1   :  { %v685_v52 = vmul.f32 %v2488_v49, %v593_v36 }
 0xc11   :  { %v688_v50 = vpop.permute.xlu1 %687 }
 0xc12   :  { %v690_v51 = vmul.f32 %v2488_v49, %v688_v50 }
 0xc14   :  { %692 = vrot.lane.b32.xlu0 %v690_v51, %s2582_s19  ;;  %v186_v51 = vadd.f32 %v2784_v61, %v2714_v11 }
 0xc86   :  { %v693_v53 = vpop.permute.xlu0 %692 }
 0xc87   :  { %v695_v54 = vadd.f32 %v693_v53, %v685_v52 }
 0xc89   :  { %2489 = vtanh.f32 %v695_v54 }
 0xc96   :  { %v2490_v55 = vpop.eup %2489 }
 0xc97   :  { %698 = vrot.lane.b32.xlu1 %v2490_v55, %s2581_s16 }
 0xd09   :  { %v699_v56 = vpop.permute.xlu1 %698 }
 0xd0a   :  { %v701_v57 = vmul.f32 %v2488_v49, %v699_v56  ;;  %v2097_v49 = vld [vmem:[%s3088_s7 + $0x8] sm:$0xff] }
 0xd0c   :  { %703 = vrot.lane.b32.xlu0 %v701_v57, %s2582_s19  ;;  %v2941_v57 = vld [vmem:[%s3093_s6] ss:$0 sm:$0xff] }
 0xd7e   :  { %v704_v58 = vpop.permute.xlu0 %703 }
 0xd7f   :  { %706 = vst.msk [vmem:[#allocation2 + $0x20] sm:$0xff] %vm191_vm2, %v704_v58  ;;  %2304 = vmatmul.mubr.msk.f32.vlgmr.msra.gmra.mxu1 %vm191_vm2, %v704_v58 }
 0xd80   :  { %2318 = vmatpush3.msra.mxu1 %v2650_v2  ;;  %2325 = vmatprep.mubr.msk.f32.mxu1 %vm2580_vm0, %v2579_v0  ;;  %v176_v2 = vadd.f32 %v2780_v59, %v2714_v11 }
 0xd81   :  { %2319 = vmatprep.subr.mxu1 %v2579_v0 }
 0xd82   :  { %2320 = vmatpush3.msra.mxu1 %v2661_v4 }
 0xd83   :  { %2321 = vmatprep.subr.mxu1 %v2579_v0 }
 0xd84   :  { %2322 = vmatpush3.msra.mxu1 %v2674_v7 }
 0xd85   :  { %2323 = vmatprep.subr.mxu1 %v2579_v0 }
 0xd86   :  { %2324 = vmatpush3.msra.mxu1 %v2682_v8  ;;  %v1017_v25 = vld [vmem:[#allocation2 + $0x20] sm:$0xff] }
 0xd87   :  { %2348 = vmatprep.subr.mxu1 %v2579_v0 }
 0xe3f   :  { %v775_v60 = vpop.f32.mrf.mxu1 }
 0xe40   :  { %v779_v63 = vadd.f32 %v775_v60, %v176_v2 }
 0xe41   :  { %v2305_v1 = vpop.f32.mrf.mxu1 }
 0xe42   :  { %2491 = vtanh.f32 %v779_v63  ;;  %v2083_v4 = vmul.f32 -1.442695, %v779_v63 }
 0xe44   :  { %2493 = vpow2.f32 %v2083_v4 }
 0xe4f   :  { %v2492_v3 = vpop.eup %2491 }
 0xe50   :  { %789 = vrot.lane.b32.xlu1 %v2492_v3, %s2581_s16 }
 0xe51   :  { %v2494_v5 = vpop.eup %2493 }
 0xe52   :  { %v783_v7 = vadd.f32 1.0, %v2494_v5 }
 0xe54   :  { %2495 = vrcp.f32 %v783_v7 }
 0xe61   :  { %v2496_v6 = vpop.eup %2495 }
 0xe62   :  { %v787_v10 = vmul.f32 %v2496_v6, %v695_v54 }
 0xec2   :  { %v790_v9 = vpop.permute.xlu1 %789 }
 0xec3   :  { %v792_v8 = vmul.f32 %v2496_v6, %v790_v9 }
 0xec5   :  { %794 = vrot.lane.b32.xlu0 %v792_v8, %s2582_s19 }
 0xf37   :  { %v795_v12 = vpop.permute.xlu0 %794 }
 0xf38   :  { %v797_v59 = vadd.f32 %v795_v12, %v787_v10 }
 0xf3a   :  { %2497 = vtanh.f32 %v797_v59 }
 0xf47   :  { %v2498_v14 = vpop.eup %2497 }
 0xf48   :  { %800 = vrot.lane.b32.xlu1 %v2498_v14, %s2581_s16 }
 0xfba   :  { %v801_v15 = vpop.permute.xlu1 %800 }
 0xfbb   :  { %v803_v16 = vmul.f32 %v2496_v6, %v801_v15 }
 0xfbd   :  { %805 = vrot.lane.b32.xlu0 %v803_v16, %s2582_s19 }
0x102f   :  { %v806_v17 = vpop.permute.xlu0 %805 }
0x1030   :  { %808 = vst.msk [vmem:[#allocation2 + $0x28] sm:$0xff] %vm191_vm2, %v806_v17  ;;  %2315 = vmatmul.mubr.msk.f32.vlgmr.msra.gmra.mxu0 %vm191_vm2, %v806_v17 }
0x1031   :  { %2329 = vmatpush3.msra.mxu0 %v1024_v13  ;;  %2336 = vmatprep.mubr.msk.f32.mxu0 %vm191_vm2, %v1013_v19 }
0x1032   :  { %2330 = vmatprep.subr.mxu0 %v1023_v18 }
0x1033   :  { %2331 = vmatpush3.msra.mxu0 %v1023_v18 }
0x1034   :  { %2332 = vmatprep.subr.mxu0 %v1022_v20 }
0x1035   :  { %2333 = vmatpush3.msra.mxu0 %v1022_v20 }
0x1036   :  { %2334 = vmatprep.subr.mxu0 %v1021_v21 }
0x1037   :  { %2335 = vmatpush3.msra.mxu0 %v1021_v21  ;;  %v1018_v26 = vld [vmem:[#allocation2 + $0x28] sm:$0xff] }
0x1038   :  { %2337 = vmatmul.mubr.msk.f32.vlgmr.msra.gmra.mxu0 %vm191_vm2, %v1014_v22  ;;  %2370 = vmatprep.subr.mxu0 %v2579_v0 }
0x1039   :  { %2339 = vmatprep.mubr.msk.f32.mxu0 %vm191_vm2, %v1015_v23  ;;  %2371 = vmatpush3.msra.mxu0 %v2877_v41 }
0x103a   :  { %2372 = vmatprep.subr.mxu0 %v2579_v0 }
0x103b   :  { %2373 = vmatpush3.msra.mxu0 %v2883_v42 }
0x103c   :  { %2340 = vmatmul.mubr.msk.f32.gmra.mxu0 %vm191_vm2, %v1016_v24  ;;  %2374 = vmatprep.subr.mxu0 %v2579_v0 }
0x103d   :  { %2342 = vmatprep.mubr.msk.f32.mxu0 %vm191_vm2, %v1017_v25  ;;  %2375 = vmatpush3.msra.mxu0 %v2890_v43 }
0x103e   :  { %2376 = vmatprep.subr.mxu0 %v2579_v0 }
0x103f   :  { %2377 = vmatpush3.msra.mxu0 %v2897_v44 }
0x1040   :  { %2343 = vmatmul.mubr.msk.f32.gmra.mxu0 %vm191_vm2, %v1018_v26  ;;  %2392 = vmatprep.subr.mxu0 %v2579_v0 }
0x10f0   :  { %v877_v28 = vpop.f32.mrf.mxu0 }
0x10f1   :  { %v881_v29 = vadd.f32 %v877_v28, %v181_v27 }
0x10f2   :  { %v2316_v30 = vpop.f32.mrf.mxu0 }
0x10f3   :  { %2499 = vtanh.f32 %v881_v29  ;;  %v2085_v32 = vmul.f32 -1.442695, %v881_v29 }
0x10f5   :  { %2501 = vpow2.f32 %v2085_v32 }
0x10f8   :  { %v2936_v52 = vpop.f32.mrf.mxu0 }
0x10f9   :  { %v1132_v28 = vadd.f32 %v2936_v52, %v2941_v57 }
0x10fa   :  { %v1126_v56 = vpop.f32.mrf.mxu0 }
0x10fb   :  { %v1127_v58 = vadd.f32 %v2941_v57, %v1126_v56 }
0x1100   :  { %v2500_v31 = vpop.eup %2499 }
0x1101   :  { %891 = vrot.lane.b32.xlu1 %v2500_v31, %s2581_s16 }
0x1102   :  { %v2502_v33 = vpop.eup %2501 }
0x1103   :  { %v885_v34 = vadd.f32 1.0, %v2502_v33 }
0x1105   :  { %2503 = vrcp.f32 %v885_v34 }
0x1112   :  { %v2504_v35 = vpop.eup %2503 }
0x1113   :  { %v889_v38 = vmul.f32 %v2504_v35, %v797_v59 }
0x1173   :  { %v892_v36 = vpop.permute.xlu1 %891 }
0x1174   :  { %v894_v37 = vmul.f32 %v2504_v35, %v892_v36 }
0x1176   :  { %896 = vrot.lane.b32.xlu0 %v894_v37, %s2582_s19 }
0x11e8   :  { %v897_v39 = vpop.permute.xlu0 %896 }
0x11e9   :  { %v2870_v62 = vadd.f32 %v897_v39, %v889_v38 }
0x11eb   :  { %2505 = vtanh.f32 %v2870_v62 }
0x11f8   :  { %v2506_v40 = vpop.eup %2505 }
0x11f9   :  { %902 = vrot.lane.b32.xlu1 %v2506_v40, %s2581_s16 }
0x126b   :  { %v903_v45 = vpop.permute.xlu1 %902 }
0x126c   :  { %v905_v46 = vmul.f32 %v2504_v35, %v903_v45 }
0x126e   :  { %907 = vrot.lane.b32.xlu0 %v905_v46, %s2582_s19 }
0x1272   :  { %1251 = vrot.lane.b32.xlu0 %v2098_v47, %s2582_s19 }
0x12e0   :  { %v908_v48 = vpop.permute.xlu0 %907 }
0x12e1   :  { %910 = vst.msk [vmem:[#allocation2 + $0x30] sm:$0xff] %vm191_vm2, %v908_v48  ;;  %2326 = vmatmul.mubr.msk.f32.vlgmr.msra.gmra.mxu1 %vm191_vm2, %v908_v48 }
0x12e2   :  { %2349 = vmatpush3.msra.mxu1 %v2877_v41  ;;  %2356 = vmatprep.mubr.msk.f32.mxu1 %vm2580_vm0, %v2579_v0 }
0x12e3   :  { %2350 = vmatprep.subr.mxu1 %v2579_v0 }
0x12e4   :  { %2351 = vmatpush3.msra.mxu1 %v2883_v42  ;;  %v1252_v6 = vpop.permute.xlu0 %1251 }
0x12e5   :  { %2352 = vmatprep.subr.mxu1 %v2579_v0 }
0x12e6   :  { %2353 = vmatpush3.msra.mxu1 %v2890_v43 }
0x12e7   :  { %2354 = vmatprep.subr.mxu1 %v2579_v0 }
0x12e8   :  { %2355 = vmatpush3.msra.mxu1 %v2897_v44  ;;  %v1019_v50 = vld [vmem:[#allocation2 + $0x30] sm:$0xff] }
0x12e9   :  { %2357 = vmatmul.mubr.msk.f32.vlgmr.msra.gmra.mxu1 %vm191_vm2, %v2097_v49  ;;  %2345 = vmatprep.mubr.msk.f32.mxu0 %vm191_vm2, %v1019_v50 }
0x12ea   :  { %2359 = vmatprep.subr.mxu1 %v2579_v0  ;;  %2367 = vmatprep.mubr.msk.f32.mxu1 %vm2580_vm0, %v2579_v0 }
0x12eb   :  { %2360 = vmatpush3.msra.mxu1 %v2877_v41 }
0x12ec   :  { %2361 = vmatprep.subr.mxu1 %v2579_v0 }
0x12ed   :  { %2362 = vmatpush3.msra.mxu1 %v2883_v42 }
0x12ee   :  { %2363 = vmatprep.subr.mxu1 %v2579_v0 }
0x12ef   :  { %2364 = vmatpush3.msra.mxu1 %v2890_v43 }
0x12f0   :  { %2365 = vmatprep.subr.mxu1 %v2579_v0 }
0x12f1   :  { %2366 = vmatpush3.msra.mxu1 %v2897_v44 }
0x12f2   :  { %2381 = vmatprep.subr.mxu1 %v2579_v0 }
0x13a1   :  { %v979_v53 = vpop.f32.mrf.mxu1 }
0x13a2   :  { %v983_v54 = vadd.f32 %v979_v53, %v186_v51  ;;  %v2341_v51 = vpop.f32.mrf.mxu0 }
0x13a3   :  { %v2327_v55 = vpop.f32.mrf.mxu1 }
0x13a4   :  { %v2087_v13 = vmul.f32 -1.442695, %v983_v54  ;;  %v1136_v52 = vpop.f32.mrf.mxu0 }
0x13a6   :  { %v2985_v53 = vpop.f32.mrf.mxu0 }
0x13a9   :  { %v1238_v2 = vpop.f32.mrf.mxu1 }
0x13aa   :  { %v1242_v60 = vadd.f32 %v1238_v2, %v1127_v58  ;;  %v1137_v58 = vadd.f32 %v2941_v57, %v1136_v52 }
0x13ab   :  { %v2358_v63 = vpop.f32.mrf.mxu1 }
0x13ac   :  { %2507 = vtanh.f32 %v1242_v60  ;;  %v2100_v11 = vmul.f32 -1.442695, %v1242_v60 }
0x13ae   :  { %2509 = vpow2.f32 %v2100_v11 }
0x13b9   :  { %v2508_v1 = vpop.eup %2507 }
0x13ba   :  { %1256 = vrot.lane.b32.xlu1 %v2508_v1, %s2581_s16 }
0x13bb   :  { %v2510_v61 = vpop.eup %2509 }
0x13bc   :  { %v1246_v3 = vadd.f32 1.0, %v2510_v61 }
0x13be   :  { %2511 = vrcp.f32 %v1246_v3 }
0x13cb   :  { %v2512_v4 = vpop.eup %2511 }
0x13cc   :  { %v1254_v9 = vmul.f32 %v2512_v4, %v1252_v6 }
0x142c   :  { %v1257_v5 = vpop.permute.xlu1 %1256 }
0x142d   :  { %v1259_v7 = vmul.f32 %v2512_v4, %v1257_v5 }
0x142f   :  { %1261 = vrot.lane.b32.xlu1 %v1259_v7, %s2582_s19 }
0x14a1   :  { %v1262_v8 = vpop.permute.xlu1 %1261 }
0x14a2   :  { %v1264_v10 = vadd.f32 %v1262_v8, %v1254_v9 }
0x14a4   :  { %2513 = vtanh.f32 %v1264_v10 }
0x14a5   :  { %2515 = vtanh.f32 %v983_v54  ;;  %v2987_v54 = vpop.f32.mrf.mxu0 }
0x14a6   :  { %2517 = vpow2.f32 %v2087_v13 }
0x14b1   :  { %v2514_v12 = vpop.eup %2513 }
0x14b2   :  { %1267 = vrot.lane.b32.xlu0 %v2514_v12, %s2581_s16  ;;  %v2516_v59 = vpop.eup %2515 }
0x14b3   :  { %v2518_v14 = vpop.eup %2517 }
0x14b4   :  { %v987_v15 = vadd.f32 1.0, %v2518_v14  ;;  %v1142_v14 = vadd.f32 %v2341_v51, %v2941_v57 }
0x14b6   :  { %993 = vrot.lane.b32.xlu0 %v2516_v59, %s2581_s16  ;;  %2519 = vrcp.f32 %v987_v15 }
0x14c3   :  { %v2520_v18 = vpop.eup %2519 }
0x14c4   :  { %v991_v22 = vmul.f32 %v2520_v18, %v2870_v62 }
0x1524   :  { %v1268_v16 = vpop.permute.xlu0 %1267 }
0x1525   :  { %v1270_v17 = vmul.f32 %v2512_v4, %v1268_v16 }
0x1527   :  { %1272 = vrot.lane.b32.xlu1 %v1270_v17, %s2582_s19 }
0x1528   :  { %v994_v19 = vpop.permute.xlu0 %993 }
0x1529   :  { %v996_v20 = vmul.f32 %v2520_v18, %v994_v19 }
0x152b   :  { %998 = vrot.lane.b32.xlu0 %v996_v20, %s2582_s19 }
0x1599   :  { %v1273_v21 = vpop.permute.xlu1 %1272 }
0x159a   :  { %2368 = vmatmul.mubr.msk.f32.vlgmr.msra.gmra.mxu1 %vm191_vm2, %v1273_v21 }
0x159b   :  { %2382 = vmatpush3.msra.mxu1 %v2877_v41  ;;  %2389 = vmatprep.mubr.msk.f32.mxu1 %vm2580_vm0, %v2579_v0 }
0x159c   :  { %2383 = vmatprep.subr.mxu1 %v2579_v0 }
0x159d   :  { %v999_v23 = vpop.permute.xlu0 %998  ;;  %2384 = vmatpush3.msra.mxu1 %v2883_v42 }
0x159e   :  { %v1001_v24 = vadd.f32 %v999_v23, %v991_v22  ;;  %2385 = vmatprep.subr.mxu1 %v2579_v0 }
0x159f   :  { %2386 = vmatpush3.msra.mxu1 %v2890_v43 }
0x15a0   :  { %2521 = vtanh.f32 %v1001_v24  ;;  %2387 = vmatprep.subr.mxu1 %v2579_v0 }
0x15a1   :  { %2388 = vmatpush3.msra.mxu1 %v2897_v44 }
0x15a2   :  { %2403 = vmatprep.subr.mxu1 %v2579_v0 }
0x15ad   :  { %v2522_v25 = vpop.eup %2521 }
0x15ae   :  { %1004 = vrot.lane.b32.xlu0 %v2522_v25, %s2581_s16 }
0x1620   :  { %v1005_v26 = vpop.permute.xlu0 %1004 }
0x1621   :  { %v1007_v27 = vmul.f32 %v2520_v18, %v1005_v26 }
0x1623   :  { %1009 = vrot.lane.b32.xlu0 %v1007_v27, %s2582_s19 }
0x165a   :  { %v1342_v29 = vpop.f32.mrf.mxu1 }
0x165b   :  { %v1346_v30 = vadd.f32 %v1342_v29, %v1132_v28 }
0x165c   :  { %v2369_v31 = vpop.f32.mrf.mxu1 }
0x165d   :  { %2523 = vtanh.f32 %v1346_v30  ;;  %v2102_v35 = vmul.f32 -1.442695, %v1346_v30 }
0x165f   :  { %2525 = vpow2.f32 %v2102_v35 }
0x166a   :  { %v2524_v32 = vpop.eup %2523 }
0x166b   :  { %1356 = vrot.lane.b32.xlu1 %v2524_v32, %s2581_s16  ;;  %v1147_v32 = vadd.f32 %v2941_v57, %v2987_v54  ;;  %v1152_v54 = vadd.f32 %v2985_v53, %v2941_v57 }
0x166c   :  { %v2526_v36 = vpop.eup %2525 }
0x166d   :  { %v1350_v37 = vadd.f32 1.0, %v2526_v36 }
0x166f   :  { %2527 = vrcp.f32 %v1350_v37 }
0x167c   :  { %v2528_v38 = vpop.eup %2527 }
0x167d   :  { %v1354_v40 = vmul.f32 %v2528_v38, %v1264_v10 }
0x1695   :  { %v1010_v33 = vpop.permute.xlu0 %1009 }
0x1696   :  { %1012 = vst.msk [vmem:[#allocation2 + $0x38] sm:$0xff] %vm191_vm2, %v1010_v33 }
0x169d   :  { %v1020_v34 = vld [vmem:[#allocation2 + $0x38] sm:$0xff] }
0x169e   :  { %2346 = vmatmul.mubr.msk.f32.gmra.mxu0 %vm191_vm2, %v1020_v34 }
0x169f   :  { %2378 = vmatprep.mubr.msk.f32.mxu0 %vm2580_vm0, %v2579_v0 }
0x16dd   :  { %v1357_v39 = vpop.permute.xlu1 %1356 }
0x16de   :  { %v1359_v62 = vmul.f32 %v2528_v38, %v1357_v39 }
0x16e0   :  { %1361 = vrot.lane.b32.xlu1 %v1359_v62, %s2582_s19 }
0x1752   :  { %v1362_v45 = vpop.permute.xlu1 %1361 }
0x1753   :  { %v1364_v46 = vadd.f32 %v1362_v45, %v1354_v40 }
0x1755   :  { %2529 = vtanh.f32 %v1364_v46 }
0x175e   :  { %v2989_v55 = vpop.f32.mrf.mxu0 }
0x1760   :  { %v2991_v56 = vpop.f32.mrf.mxu0 }
0x1762   :  { %v2530_v47 = vpop.eup %2529 }
0x1763   :  { %1367 = vrot.lane.b32.xlu1 %v2530_v47, %s2581_s16 }
0x17d5   :  { %v1368_v48 = vpop.permute.xlu1 %1367 }
0x17d6   :  { %v1370_v49 = vmul.f32 %v2528_v38, %v1368_v48 }
0x17d8   :  { %1372 = vrot.lane.b32.xlu1 %v1370_v49, %s2582_s19 }
0x184a   :  { %v1373_v50 = vpop.permute.xlu1 %1372 }
0x184b   :  { %2379 = vmatmul.mubr.msk.f32.vlgmr.msra.gmra.mxu0 %vm191_vm2, %v1373_v50 }
0x184c   :  { %2393 = vmatpush3.msra.mxu0 %v2877_v41  ;;  %2400 = vmatprep.mubr.msk.f32.mxu0 %vm2580_vm0, %v2579_v0 }
0x184d   :  { %2394 = vmatprep.subr.mxu0 %v2579_v0 }
0x184e   :  { %2395 = vmatpush3.msra.mxu0 %v2883_v42 }
0x184f   :  { %2396 = vmatprep.subr.mxu0 %v2579_v0 }
0x1850   :  { %2397 = vmatpush3.msra.mxu0 %v2890_v43 }
0x1851   :  { %2398 = vmatprep.subr.mxu0 %v2579_v0 }
0x1852   :  { %2399 = vmatpush3.msra.mxu0 %v2897_v44 }
0x1853   :  { %2414 = vmatprep.subr.mxu0 %v2579_v0 }
0x190b   :  { %v1442_v2 = vpop.f32.mrf.mxu0 }
0x190c   :  { %v1446_v60 = vadd.f32 %v1442_v2, %v1137_v58 }
0x190d   :  { %v2380_v63 = vpop.f32.mrf.mxu0 }
0x190e   :  { %2531 = vtanh.f32 %v1446_v60  ;;  %v2104_v11 = vmul.f32 -1.442695, %v1446_v60 }
0x1910   :  { %2533 = vpow2.f32 %v2104_v11 }
0x191b   :  { %v2532_v1 = vpop.eup %2531 }
0x191c   :  { %1456 = vrot.lane.b32.xlu0 %v2532_v1, %s2581_s16 }
0x191d   :  { %v2534_v61 = vpop.eup %2533 }
0x191e   :  { %v1450_v3 = vadd.f32 1.0, %v2534_v61 }
0x1920   :  { %2535 = vrcp.f32 %v1450_v3 }
0x192d   :  { %v2536_v4 = vpop.eup %2535 }
0x192e   :  { %v1454_v6 = vmul.f32 %v2536_v4, %v1364_v46 }
0x198e   :  { %v1457_v5 = vpop.permute.xlu0 %1456 }
0x198f   :  { %v1459_v7 = vmul.f32 %v2536_v4, %v1457_v5 }
0x1991   :  { %1461 = vrot.lane.b32.xlu1 %v1459_v7, %s2582_s19 }
0x1a03   :  { %v1462_v9 = vpop.permute.xlu1 %1461 }
0x1a04   :  { %v1464_v8 = vadd.f32 %v1462_v9, %v1454_v6  ;;  %v1157_v9 = vadd.f32 %v2941_v57, %v2991_v56 }
0x1a06   :  { %2537 = vtanh.f32 %v1464_v8 }
0x1a13   :  { %v2538_v10 = vpop.eup %2537 }
0x1a14   :  { %1467 = vrot.lane.b32.xlu0 %v2538_v10, %s2581_s16 }
0x1a86   :  { %v1468_v12 = vpop.permute.xlu0 %1467 }
0x1a87   :  { %v1470_v59 = vmul.f32 %v2536_v4, %v1468_v12 }
0x1a89   :  { %1472 = vrot.lane.b32.xlu1 %v1470_v59, %s2582_s19 }
0x1afb   :  { %v1473_v13 = vpop.permute.xlu1 %1472 }
0x1afc   :  { %2390 = vmatmul.mubr.msk.f32.vlgmr.msra.gmra.mxu1 %vm191_vm2, %v1473_v13 }
0x1afd   :  { %2404 = vmatpush3.msra.mxu1 %v2877_v41  ;;  %2411 = vmatprep.mubr.msk.f32.mxu1 %vm2580_vm0, %v2579_v0 }
0x1afe   :  { %2405 = vmatprep.subr.mxu1 %v2579_v0 }
0x1aff   :  { %2406 = vmatpush3.msra.mxu1 %v2883_v42 }
0x1b00   :  { %2407 = vmatprep.subr.mxu1 %v2579_v0 }
0x1b01   :  { %2408 = vmatpush3.msra.mxu1 %v2890_v43 }
0x1b02   :  { %2409 = vmatprep.subr.mxu1 %v2579_v0 }
0x1b03   :  { %2410 = vmatpush3.msra.mxu1 %v2897_v44 }
0x1b04   :  { %2425 = vmatprep.subr.mxu1 %v2579_v0 }
0x1bbc   :  { %v1542_v15 = vpop.f32.mrf.mxu1 }
0x1bbd   :  { %v1546_v16 = vadd.f32 %v1542_v15, %v1142_v14 }
0x1bbe   :  { %v2391_v17 = vpop.f32.mrf.mxu1 }
0x1bbf   :  { %2539 = vtanh.f32 %v1546_v16  ;;  %v2106_v19 = vmul.f32 -1.442695, %v1546_v16 }
0x1bc1   :  { %2541 = vpow2.f32 %v2106_v19 }
0x1bcc   :  { %v2540_v18 = vpop.eup %2539 }
0x1bcd   :  { %1556 = vrot.lane.b32.xlu0 %v2540_v18, %s2581_s16 }
0x1bce   :  { %v2542_v20 = vpop.eup %2541 }
0x1bcf   :  { %v1550_v21 = vadd.f32 1.0, %v2542_v20 }
0x1bd1   :  { %2543 = vrcp.f32 %v1550_v21 }
0x1bde   :  { %v2544_v22 = vpop.eup %2543 }
0x1bdf   :  { %v1554_v25 = vmul.f32 %v2544_v22, %v1464_v8 }
0x1c3f   :  { %v1557_v23 = vpop.permute.xlu0 %1556 }
0x1c40   :  { %v1559_v24 = vmul.f32 %v2544_v22, %v1557_v23 }
0x1c42   :  { %1561 = vrot.lane.b32.xlu1 %v1559_v24, %s2582_s19 }
0x1cb4   :  { %v1562_v26 = vpop.permute.xlu1 %1561 }
0x1cb5   :  { %v1564_v27 = vadd.f32 %v1562_v26, %v1554_v25  ;;  %v1162_v25 = vadd.f32 %v2989_v55, %v2941_v57  ;;  %v1974_v55 = vld [vmem:[%s3094_s9 + $0x18] sm:$0xff] }
0x1cb7   :  { %2545 = vtanh.f32 %v1564_v27 }
0x1cc4   :  { %v2546_v28 = vpop.eup %2545 }
0x1cc5   :  { %1567 = vrot.lane.b32.xlu0 %v2546_v28, %s2581_s16 }
0x1d37   :  { %v1568_v29 = vpop.permute.xlu0 %1567 }
0x1d38   :  { %v1570_v30 = vmul.f32 %v2544_v22, %v1568_v29 }
0x1d3a   :  { %1572 = vrot.lane.b32.xlu1 %v1570_v30, %s2582_s19 }
0x1dac   :  { %v1573_v31 = vpop.permute.xlu1 %1572 }
0x1dad   :  { %2401 = vmatmul.mubr.msk.f32.vlgmr.msra.gmra.mxu0 %vm191_vm2, %v1573_v31 }
0x1dae   :  { %2415 = vmatpush3.msra.mxu0 %v2877_v41  ;;  %2422 = vmatprep.mubr.msk.f32.mxu0 %vm2580_vm0, %v2579_v0 }
0x1daf   :  { %2416 = vmatprep.subr.mxu0 %v2579_v0 }
0x1db0   :  { %2417 = vmatpush3.msra.mxu0 %v2883_v42 }
0x1db1   :  { %2418 = vmatprep.subr.mxu0 %v2579_v0 }
0x1db2   :  { %2419 = vmatpush3.msra.mxu0 %v2890_v43 }
0x1db3   :  { %2420 = vmatprep.subr.mxu0 %v2579_v0 }
0x1db4   :  { %2421 = vmatpush3.msra.mxu0 %v2897_v44 }
0x1db5   :  { %2436 = vmatprep.subr.mxu0 %v2579_v0 }
0x1e6d   :  { %v1642_v33 = vpop.f32.mrf.mxu0 }
0x1e6e   :  { %v1646_v34 = vadd.f32 %v1642_v33, %v1147_v32 }
0x1e6f   :  { %v2402_v35 = vpop.f32.mrf.mxu0 }
0x1e70   :  { %2547 = vtanh.f32 %v1646_v34  ;;  %v2108_v37 = vmul.f32 -1.442695, %v1646_v34 }
0x1e72   :  { %2549 = vpow2.f32 %v2108_v37 }
0x1e7d   :  { %v2548_v36 = vpop.eup %2547 }
0x1e7e   :  { %1656 = vrot.lane.b32.xlu0 %v2548_v36, %s2581_s16 }
0x1e7f   :  { %v2550_v38 = vpop.eup %2549 }
0x1e80   :  { %v1650_v39 = vadd.f32 1.0, %v2550_v38  ;;  %v1973_v38 = vld [vmem:[%s3094_s9 + $0x10] sm:$0xff] }
0x1e82   :  { %2551 = vrcp.f32 %v1650_v39  ;;  %v1972_v39 = vld [vmem:[%s3094_s9 + $0x8] sm:$0xff] }
0x1e8f   :  { %v2552_v62 = vpop.eup %2551 }
0x1e90   :  { %v1654_v46 = vmul.f32 %v2552_v62, %v1564_v27 }
0x1ef0   :  { %v1657_v40 = vpop.permute.xlu0 %1656 }
0x1ef1   :  { %v1659_v45 = vmul.f32 %v2552_v62, %v1657_v40 }
0x1ef3   :  { %1661 = vrot.lane.b32.xlu1 %v1659_v45, %s2582_s19 }
0x1f65   :  { %v1662_v47 = vpop.permute.xlu1 %1661 }
0x1f66   :  { %v1664_v48 = vadd.f32 %v1662_v47, %v1654_v46 }
0x1f68   :  { %2553 = vtanh.f32 %v1664_v48 }
0x1f75   :  { %v2554_v49 = vpop.eup %2553 }
0x1f76   :  { %1667 = vrot.lane.b32.xlu0 %v2554_v49, %s2581_s16 }
0x1fe8   :  { %v1668_v50 = vpop.permute.xlu0 %1667 }
0x1fe9   :  { %v1670_v51 = vmul.f32 %v2552_v62, %v1668_v50  ;;  %v1971_v62 = vld [vmem:[%s3094_s9] sm:$0xff] }
0x1feb   :  { %1672 = vrot.lane.b32.xlu1 %v1670_v51, %s2582_s19 }
0x205d   :  { %v1673_v52 = vpop.permute.xlu1 %1672 }
0x205e   :  { %2412 = vmatmul.mubr.msk.f32.vlgmr.msra.gmra.mxu1 %vm191_vm2, %v1673_v52 }
0x205f   :  { %2426 = vmatpush3.msra.mxu1 %v2877_v41  ;;  %2433 = vmatprep.mubr.msk.f32.mxu1 %vm2580_vm0, %v2579_v0 }
0x2060   :  { %2427 = vmatprep.subr.mxu1 %v2579_v0 }
0x2061   :  { %2428 = vmatpush3.msra.mxu1 %v2883_v42 }
0x2062   :  { %2429 = vmatprep.subr.mxu1 %v2579_v0 }
0x2063   :  { %2430 = vmatpush3.msra.mxu1 %v2890_v43 }
0x2064   :  { %2431 = vmatprep.subr.mxu1 %v2579_v0 }
0x2065   :  { %2432 = vmatpush3.msra.mxu1 %v2897_v44 }
0x211e   :  { %v1742_v58 = vpop.f32.mrf.mxu1 }
0x211f   :  { %v1746_v41 = vadd.f32 %v1742_v58, %v1152_v54 }
0x2120   :  { %v2413_v2 = vpop.f32.mrf.mxu1 }
0x2121   :  { %2555 = vtanh.f32 %v1746_v41  ;;  %v2110_v63 = vmul.f32 -1.442695, %v1746_v41 }
0x2123   :  { %2557 = vpow2.f32 %v2110_v63 }
0x212e   :  { %v2556_v60 = vpop.eup %2555 }
0x212f   :  { %1756 = vrot.lane.b32.xlu0 %v2556_v60, %s2581_s16 }
0x2130   :  { %v2558_v42 = vpop.eup %2557 }
0x2131   :  { %v1750_v1 = vadd.f32 1.0, %v2558_v42 }
0x2133   :  { %2559 = vrcp.f32 %v1750_v1 }
0x2140   :  { %v2560_v43 = vpop.eup %2559 }
0x2141   :  { %v1754_v44 = vmul.f32 %v2560_v43, %v1664_v48  ;;  %v2115_v48 = vld [vmem:[%s3095_s10] ss:$0 sm:$0xff] }
0x21a1   :  { %v1757_v11 = vpop.permute.xlu0 %1756 }
0x21a2   :  { %v1759_v61 = vmul.f32 %v2560_v43, %v1757_v11 }
0x21a4   :  { %1761 = vrot.lane.b32.xlu1 %v1759_v61, %s2582_s19 }
0x2216   :  { %v1762_v3 = vpop.permute.xlu1 %1761 }
0x2217   :  { %v1764_v53 = vadd.f32 %v1762_v3, %v1754_v44 }
0x2219   :  { %2561 = vtanh.f32 %v1764_v53 }
0x2226   :  { %v2562_v4 = vpop.eup %2561 }
0x2227   :  { %1767 = vrot.lane.b32.xlu0 %v2562_v4, %s2581_s16 }
0x2299   :  { %v1768_v5 = vpop.permute.xlu0 %1767 }
0x229a   :  { %v1770_v7 = vmul.f32 %v2560_v43, %v1768_v5 }
0x229c   :  { %1772 = vrot.lane.b32.xlu1 %v1770_v7, %s2582_s19 }
0x230e   :  { %v1773_v6 = vpop.permute.xlu1 %1772 }
0x230f   :  { %2423 = vmatmul.mubr.msk.f32.vlgmr.msra.gmra.mxu0 %vm191_vm2, %v1773_v6 }
0x2310   :  { %2444 = vmatprep.mubr.msk.f32.mxu0 %vm2580_vm0, %v2579_v0  ;;  %2437 = vmatpush3.msra.mxu0 %v1974_v55 }
0x2311   :  { %2438 = vmatprep.subr.mxu0 %v2579_v0 }
0x2312   :  { %2439 = vmatpush3.msra.mxu0 %v1973_v38 }
0x2313   :  { %2440 = vmatprep.subr.mxu0 %v2579_v0 }
0x2314   :  { %2441 = vmatpush3.msra.mxu0 %v1972_v39 }
0x2315   :  { %2442 = vmatprep.subr.mxu0 %v2579_v0 }
0x2316   :  { %2443 = vmatpush3.msra.mxu0 %v1971_v62 }
0x23cf   :  { %v1842_v8 = vpop.f32.mrf.mxu0 }
0x23d0   :  { %v1846_v10 = vadd.f32 %v1842_v8, %v1157_v9 }
0x23d1   :  { %v2424_v12 = vpop.f32.mrf.mxu0 }
0x23d2   :  { %2563 = vtanh.f32 %v1846_v10  ;;  %v2112_v13 = vmul.f32 -1.442695, %v1846_v10 }
0x23d4   :  { %2565 = vpow2.f32 %v2112_v13 }
0x23df   :  { %v2564_v59 = vpop.eup %2563 }
0x23e0   :  { %1856 = vrot.lane.b32.xlu0 %v2564_v59, %s2581_s16 }
0x23e1   :  { %v2566_v14 = vpop.eup %2565 }
0x23e2   :  { %v1850_v15 = vadd.f32 1.0, %v2566_v14 }
0x23e4   :  { %2567 = vrcp.f32 %v1850_v15 }
0x23f1   :  { %v2568_v16 = vpop.eup %2567 }
0x23f2   :  { %v1854_v19 = vmul.f32 %v2568_v16, %v1764_v53 }
0x2452   :  { %v1857_v17 = vpop.permute.xlu0 %1856 }
0x2453   :  { %v1859_v18 = vmul.f32 %v2568_v16, %v1857_v17 }
0x2455   :  { %1861 = vrot.lane.b32.xlu1 %v1859_v18, %s2582_s19 }
0x24c7   :  { %v1862_v20 = vpop.permute.xlu1 %1861 }
0x24c8   :  { %v1864_v56 = vadd.f32 %v1862_v20, %v1854_v19 }
0x24ca   :  { %2569 = vtanh.f32 %v1864_v56 }
0x24d7   :  { %v2570_v21 = vpop.eup %2569 }
0x24d8   :  { %1867 = vrot.lane.b32.xlu0 %v2570_v21, %s2581_s16 }
0x254a   :  { %v1868_v22 = vpop.permute.xlu0 %1867 }
0x254b   :  { %v1870_v23 = vmul.f32 %v2568_v16, %v1868_v22 }
0x254d   :  { %1872 = vrot.lane.b32.xlu1 %v1870_v23, %s2582_s19 }
0x25bf   :  { %v1873_v24 = vpop.permute.xlu1 %1872 }
0x25c0   :  { %2434 = vmatmul.mubr.msk.f32.vlgmr.msra.gmra.mxu1 %vm191_vm2, %v1873_v24 }
0x2680   :  { %v1942_v26 = vpop.f32.mrf.mxu1 }
0x2681   :  { %v1946_v27 = vadd.f32 %v1942_v26, %v1162_v25 }
0x2682   :  { %v2435_v28 = vpop.f32.mrf.mxu1 }
0x2683   :  { %2571 = vtanh.f32 %v1946_v27  ;;  %v2114_v30 = vmul.f32 -1.442695, %v1946_v27 }
0x2685   :  { %2573 = vpow2.f32 %v2114_v30 }
0x2690   :  { %v2572_v29 = vpop.eup %2571 }
0x2691   :  { %1956 = vrot.lane.b32.xlu0 %v2572_v29, %s2581_s16 }
0x2692   :  { %v2574_v31 = vpop.eup %2573 }
0x2693   :  { %v1950_v32 = vadd.f32 1.0, %v2574_v31 }
0x2695   :  { %2575 = vrcp.f32 %v1950_v32 }
0x26a2   :  { %v2576_v33 = vpop.eup %2575 }
0x26a3   :  { %v1954_v36 = vmul.f32 %v2576_v33, %v1864_v56 }
0x2703   :  { %v1957_v34 = vpop.permute.xlu0 %1956 }
0x2704   :  { %v1959_v35 = vmul.f32 %v2576_v33, %v1957_v34 }
0x2706   :  { %1961 = vrot.lane.b32.xlu1 %v1959_v35, %s2582_s19 }
0x2778   :  { %v1962_v37 = vpop.permute.xlu1 %1961 }
0x2779   :  { %v1964_v57 = vadd.f32 %v1962_v37, %v1954_v36 }
0x277b   :  { %2577 = vtanh.f32 %v1964_v57 }
0x2788   :  { %v2578_v40 = vpop.eup %2577 }
0x2789   :  { %1967 = vrot.lane.b32.xlu0 %v2578_v40, %s2581_s16 }
0x27fb   :  { %v1968_v45 = vpop.permute.xlu0 %1967 }
0x27fc   :  { %v1970_v46 = vmul.f32 %v2576_v33, %v1968_v45 }
0x27fe   :  { %1983 = vrot.lane.b32.xlu1 %v1970_v46, %s2582_s19 }
0x2870   :  { %v1984_v47 = vpop.permute.xlu1 %1983 }
0x2871   :  { %2445 = vmatmul.mubr.msk.f32.vlgmr.msra.gmra.mxu0 %vm191_vm2, %v1984_v47 }
0x2931   :  { %v2053_v49 = vpop.f32.mrf.mxu0 }
0x2932   :  { %v2054_v50 = vadd.f32 %v2115_v48, %v2053_v49 }
0x2933   :  { %v2446_v51 = vpop.f32.mrf.mxu0 }
0x2934   :  { %2058 = vst.msk [vmem:[%s3096_s11] sm:$0xff] %vm2057_vm3, %v2054_v50 }

</bundles_post_ra>
